<compile_context>
chip_gen: v5e
topology: v5e:2x2
jax: 0.10.0
libtpu: 0.0.40
codegen_flags: <defaults>
</compile_context>

<pallas_src>
import jax
import jax.numpy as jnp
from jax.experimental import pallas as pl
from jax.experimental.pallas import tpu as pltpu

H1 = 512          # padded hidden width of layer 1 (400 -> 512)
H2 = 384          # padded hidden width of layer 2 (300 -> 384)
TILE_B_MAX = 512  # per-tile batch rows (multiple of 16)


def _round_up(x, m):
    return (x + m - 1) // m * m


def _critic_kernel(x_ref, y_ref, w14_ref, b14_ref, w2_ref, b2_ref,
                   w5_ref, b5_ref, w3_ref, w6_ref, bout_ref, q_ref):
    h1 = w2_ref.shape[0]                       # padded layer-1 width (512)

    # ---- Assemble the (TB, K_PAD) bf16 input tile in VMEM (no HBM round trip) ----
    xb = x_ref[...].astype(jnp.bfloat16)
    yb = y_ref[...].astype(jnp.bfloat16)
    pad_k = w14_ref.shape[0] - xb.shape[1] - yb.shape[1]
    parts = [xb, yb]
    if pad_k > 0:
        parts.append(jnp.zeros((xb.shape[0], pad_k), jnp.bfloat16))
    xy = jnp.concatenate(parts, axis=1)                                # (TB, 16)

    # ---- Layer 1, both heads fused: (TB, 1024) ----
    h14 = jnp.dot(xy, w14_ref[...], preferred_element_type=jnp.float32) + b14_ref[...]
    h14 = jnp.maximum(h14, 0.0)
    h = h14[:, :h1].astype(jnp.bfloat16)                               # Q1 hidden (TB, 512)
    g = h14[:, h1:].astype(jnp.bfloat16)                               # Q2 hidden (TB, 512)

    # ---- Layer 2, per head: (TB, 384) ----
    h2 = jnp.maximum(
        jnp.dot(h, w2_ref[...], preferred_element_type=jnp.float32) + b2_ref[...], 0.0)
    g2 = jnp.maximum(
        jnp.dot(g, w5_ref[...], preferred_element_type=jnp.float32) + b5_ref[...], 0.0)

    # ---- Layer 3: VPU multiply + lane reduction (avoids lane-sparse N=2 MXU pass) ----
    q1 = jnp.sum(h2 * w3_ref[...], axis=-1, keepdims=True)             # (TB, 1)
    q2 = jnp.sum(g2 * w6_ref[...], axis=-1, keepdims=True)             # (TB, 1)
    q_ref[...] = (jnp.concatenate([q1, q2], axis=1) + bout_ref[...]).astype(q_ref.dtype)


def pack_critic_params(params):
    """Pad / fuse raw (W.T, bias) params into the lane-aligned kernel layout."""
    k = params["w1"].shape[0]                  # state_dim + action_dim
    k_pad = _round_up(k, 16)

    def pad_w(w, rows, cols):
        return jnp.zeros((rows, cols), jnp.float32).at[:w.shape[0], :w.shape[1]].set(w)

    def pad_row(v, cols):
        return jnp.zeros((1, cols), jnp.float32).at[:, :v.shape[1]].set(v)

    w14 = jnp.concatenate([pad_w(params["w1"], k_pad, H1),
                           pad_w(params["w4"], k_pad, H1)], axis=1)        # (16, 1024)
    b14 = jnp.concatenate([pad_row(params["b1"], H1),
                           pad_row(params["b4"], H1)], axis=1)             # (1, 1024)
    w2 = pad_w(params["w2"], H1, H2)
    b2 = pad_row(params["b2"], H2)
    w5 = pad_w(params["w5"], H1, H2)
    b5 = pad_row(params["b5"], H2)
    w3 = pad_row(params["w3"].T, H2)                                       # (1, 384) f32
    w6 = pad_row(params["w6"].T, H2)                                       # (1, 384) f32
    bout = jnp.concatenate([params["b3"], params["b6"]], axis=1)           # (1, 2)

    bf16 = lambda a: a.astype(jnp.bfloat16)
    return dict(w14=bf16(w14), b14=b14, w2=bf16(w2), b2=b2,
                w5=bf16(w5), b5=b5, w3=w3, w6=w6, bout=bout)


def critic_forward(x, y, packed):
    """x: (B, state_dim), y: (B, action_dim). Returns (q1, q2), each (B, 1) f32."""
    B = x.shape[0]
    k = x.shape[1] + y.shape[1]
    k_pad = packed["w14"].shape[0]
    assert k <= k_pad, "state_dim + action_dim exceeds packed weight rows"

    # >=2 tiles for B > 16 (megacore sharding on v7x), tile rows multiple of 16 (bf16 sublanes).
    tile_b = min(TILE_B_MAX, _round_up(max(-(-B // 2), 1), 16))
    b_pad = _round_up(max(B, 1), tile_b)
    if b_pad != B:
        x = jnp.pad(x, ((0, b_pad - B), (0, 0)))
        y = jnp.pad(y, ((0, b_pad - B), (0, 0)))

    batch_map = lambda i: (i, 0)     # tiles over batch
    resident = lambda i: (0, 0)      # weights/biases: same block every step -> stay in VMEM
    full = lambda arr: pl.BlockSpec(arr.shape, resident)

    weight_names = ("w14", "b14", "w2", "b2", "w5", "b5", "w3", "w6", "bout")
    in_specs = ([pl.BlockSpec((tile_b, x.shape[1]), batch_map),
                 pl.BlockSpec((tile_b, y.shape[1]), batch_map)]
                + [full(packed[n]) for n in weight_names])
    out_specs = pl.BlockSpec((tile_b, 2), batch_map)

    flops = 2 * b_pad * (k_pad * 2 * H1 + 2 * H1 * H2 + 2 * H2)
    bytes_accessed = int(
        x.size * x.dtype.itemsize + y.size * y.dtype.itemsize
        + sum(packed[n].size * packed[n].dtype.itemsize for n in weight_names)
        + b_pad * 2 * 4)

    q = pl.pallas_call(
        _critic_kernel,
        out_shape=jax.ShapeDtypeStruct((b_pad, 2), jnp.float32),
        grid=(b_pad // tile_b,),
        in_specs=in_specs,
        out_specs=out_specs,
        compiler_params=pltpu.CompilerParams(
            dimension_semantics=("parallel",),
            vmem_limit_bytes=32 * 1024 * 1024),
        cost_estimate=pl.CostEstimate(flops=flops, transcendentals=0,
                                      bytes_accessed=bytes_accessed),
    )(x, y, *(packed[n] for n in weight_names))

    return q[:B, 0:1], q[:B, 1:2]


def init_params(key, state_dim, action_dim):
    """Deterministic synthetic init mirroring nn.Linear shapes (stored as W.T, bias as (1, out))."""
    dims = [
        ("w1", "b1", state_dim + action_dim, 400),
        ("w2", "b2", 400, 300),
        ("w3", "b3", 300, 1),
        ("w4", "b4", state_dim + action_dim, 400),
        ("w5", "b5", 400, 300),
        ("w6", "b6", 300, 1),
    ]
    params = {}
    for wname, bname, fan_in, fan_out in dims:
        key, kw, kb = jax.random.split(key, 3)
        bound = 1.0 / jnp.sqrt(jnp.float32(fan_in))
        params[wname] = jax.random.uniform(kw, (fan_in, fan_out), jnp.float32,
                                           minval=-bound, maxval=bound)
        params[bname] = jax.random.uniform(kb, (1, fan_out), jnp.float32,
                                           minval=-bound, maxval=bound)
    return params


def _reference_forward(x, y, p):
    """Pure-JAX f32 reference for a sanity check."""
    xy = jnp.concatenate([x, y], axis=1)
    h = jnp.maximum(xy @ p["w1"] + p["b1"], 0.0)
    h = jnp.maximum(h @ p["w2"] + p["b2"], 0.0)
    q1 = h @ p["w3"] + p["b3"]
    g = jnp.maximum(xy @ p["w4"] + p["b4"], 0.0)
    g = jnp.maximum(g @ p["w5"] + p["b5"], 0.0)
    q2 = g @ p["w6"] + p["b6"]
    return q1, q2


if __name__ == "__main__":
    key = jax.random.PRNGKey(0)
    state_dim, action_dim, batch = 8, 4, 2

    key, kx, ky, kp = jax.random.split(key, 4)
    x = jax.random.normal(kx, (batch, state_dim), jnp.float32)
    y = jax.random.normal(ky, (batch, action_dim), jnp.float32)
    params = init_params(kp, state_dim, action_dim)
    packed = pack_critic_params(params)

    q1, q2 = critic_forward(x, y, packed)
    jax.block_until_ready((q1, q2))

    r1, r2 = _reference_forward(x, y, params)
    assert q1.shape == (batch, 1) and q2.shape == (batch, 1)
    # bf16 matmul operands (f32 accumulation) -> looser tolerance than pure f32.
    assert jnp.allclose(q1, r1, atol=5e-2, rtol=5e-2)
    assert jnp.allclose(q2, r2, atol=5e-2, rtol=5e-2)

    print("KERNEL_OK")
</pallas_src>

<mosaic_0001>
module attributes {stable_mosaic.version = 11 : i64} {
  func.func @_critic_kernel(%arg0: i32, %arg1: memref<16x8xf32, #tpu.memory_space<vmem>>, %arg2: memref<16x4xf32, #tpu.memory_space<vmem>>, %arg3: memref<16x1024xbf16, #tpu.memory_space<vmem>>, %arg4: memref<1x1024xf32, #tpu.memory_space<vmem>>, %arg5: memref<512x384xbf16, #tpu.memory_space<vmem>>, %arg6: memref<1x384xf32, #tpu.memory_space<vmem>>, %arg7: memref<512x384xbf16, #tpu.memory_space<vmem>>, %arg8: memref<1x384xf32, #tpu.memory_space<vmem>>, %arg9: memref<1x384xf32, #tpu.memory_space<vmem>>, %arg10: memref<1x384xf32, #tpu.memory_space<vmem>>, %arg11: memref<1x2xf32, #tpu.memory_space<vmem>>, %arg12: memref<16x2xf32, #tpu.memory_space<vmem>>) attributes {dimension_semantics = [#tpu.dimension_semantics<parallel>], iteration_bounds = array<i64: 1>, scalar_prefetch = 0 : i64, scratch_operands = 0 : i64, tpu.core_type = #tpu.core_type<tc>, window_params = [{transform_indices = @transform_0, window_bounds = array<i64: 16, 8>}, {transform_indices = @transform_1, window_bounds = array<i64: 16, 4>}, {pipeline_mode = #tpu.pipeline_mode<synchronous>, transform_indices = @transform_2, window_bounds = array<i64: 16, 1024>}, {pipeline_mode = #tpu.pipeline_mode<synchronous>, transform_indices = @transform_3, window_bounds = array<i64: 1, 1024>}, {pipeline_mode = #tpu.pipeline_mode<synchronous>, transform_indices = @transform_4, window_bounds = array<i64: 512, 384>}, {pipeline_mode = #tpu.pipeline_mode<synchronous>, transform_indices = @transform_5, window_bounds = array<i64: 1, 384>}, {pipeline_mode = #tpu.pipeline_mode<synchronous>, transform_indices = @transform_6, window_bounds = array<i64: 512, 384>}, {pipeline_mode = #tpu.pipeline_mode<synchronous>, transform_indices = @transform_7, window_bounds = array<i64: 1, 384>}, {pipeline_mode = #tpu.pipeline_mode<synchronous>, transform_indices = @transform_8, window_bounds = array<i64: 1, 384>}, {pipeline_mode = #tpu.pipeline_mode<synchronous>, transform_indices = @transform_9, window_bounds = array<i64: 1, 384>}, {pipeline_mode = #tpu.pipeline_mode<synchronous>, transform_indices = @transform_10, window_bounds = array<i64: 1, 2>}, {transform_indices = @transform_11, window_bounds = array<i64: 16, 2>}]} {
    %c0 = arith.constant 0 : index
    %c0_0 = arith.constant 0 : index
    %0 = vector.load %arg1[%c0, %c0_0] : memref<16x8xf32, #tpu.memory_space<vmem>>, vector<16x8xf32>
    %1 = arith.truncf %0 : vector<16x8xf32> to vector<16x8xbf16>
    %c0_1 = arith.constant 0 : index
    %c0_2 = arith.constant 0 : index
    %2 = vector.load %arg2[%c0_1, %c0_2] : memref<16x4xf32, #tpu.memory_space<vmem>>, vector<16x4xf32>
    %3 = arith.truncf %2 : vector<16x4xf32> to vector<16x4xbf16>
    %cst = arith.constant 0.000000e+00 : bf16
    %4 = vector.broadcast %cst : bf16 to vector<16x4xbf16>
    %5 = tpu.concatenate %1, %3, %4 in 1 : vector<16x8xbf16>, vector<16x4xbf16>, vector<16x4xbf16> -> vector<16x16xbf16>
    %c0_3 = arith.constant 0 : index
    %c0_4 = arith.constant 0 : index
    %6 = vector.load %arg3[%c0_3, %c0_4] : memref<16x1024xbf16, #tpu.memory_space<vmem>>, vector<16x1024xbf16>
    %cst_5 = arith.constant dense<0.000000e+00> : vector<16x1024xf32>
    %7 = tpu.matmul %5, %6, %cst_5 {dimension_numbers = #tpu.dot_dimension_numbers<[1], [0], [0], [1], [0, 0, 1, 1], [], []>} : vector<16x16xbf16>, vector<16x1024xbf16>, vector<16x1024xf32> -> vector<16x1024xf32>
    %c0_6 = arith.constant 0 : index
    %c0_7 = arith.constant 0 : index
    %8 = vector.load %arg4[%c0_6, %c0_7] : memref<1x1024xf32, #tpu.memory_space<vmem>>, vector<1x1024xf32>
    %9 = vector.broadcast %8 : vector<1x1024xf32> to vector<16x1024xf32>
    %10 = arith.addf %7, %9 : vector<16x1024xf32>
    %cst_8 = arith.constant 0.000000e+00 : f32
    %11 = vector.broadcast %cst_8 : f32 to vector<16x1024xf32>
    %12 = arith.maximumf %10, %11 : vector<16x1024xf32>
    %13 = vector.extract_strided_slice %12 {offsets = [0, 0], sizes = [16, 512], strides = [1, 1]} : vector<16x1024xf32> to vector<16x512xf32>
    %14 = arith.truncf %13 : vector<16x512xf32> to vector<16x512xbf16>
    %15 = vector.extract_strided_slice %12 {offsets = [0, 512], sizes = [16, 512], strides = [1, 1]} : vector<16x1024xf32> to vector<16x512xf32>
    %16 = arith.truncf %15 : vector<16x512xf32> to vector<16x512xbf16>
    %c0_9 = arith.constant 0 : index
    %c0_10 = arith.constant 0 : index
    %17 = vector.load %arg5[%c0_9, %c0_10] : memref<512x384xbf16, #tpu.memory_space<vmem>>, vector<512x384xbf16>
    %cst_11 = arith.constant dense<0.000000e+00> : vector<16x384xf32>
    %18 = tpu.matmul %14, %17, %cst_11 {dimension_numbers = #tpu.dot_dimension_numbers<[1], [0], [0], [1], [0, 0, 1, 1], [], []>} : vector<16x512xbf16>, vector<512x384xbf16>, vector<16x384xf32> -> vector<16x384xf32>
    %c0_12 = arith.constant 0 : index
    %c0_13 = arith.constant 0 : index
    %19 = vector.load %arg6[%c0_12, %c0_13] : memref<1x384xf32, #tpu.memory_space<vmem>>, vector<1x384xf32>
    %20 = vector.broadcast %19 : vector<1x384xf32> to vector<16x384xf32>
    %21 = arith.addf %18, %20 : vector<16x384xf32>
    %cst_14 = arith.constant 0.000000e+00 : f32
    %22 = vector.broadcast %cst_14 : f32 to vector<16x384xf32>
    %23 = arith.maximumf %21, %22 : vector<16x384xf32>
    %c0_15 = arith.constant 0 : index
    %c0_16 = arith.constant 0 : index
    %24 = vector.load %arg7[%c0_15, %c0_16] : memref<512x384xbf16, #tpu.memory_space<vmem>>, vector<512x384xbf16>
    %cst_17 = arith.constant dense<0.000000e+00> : vector<16x384xf32>
    %25 = tpu.matmul %16, %24, %cst_17 {dimension_numbers = #tpu.dot_dimension_numbers<[1], [0], [0], [1], [0, 0, 1, 1], [], []>} : vector<16x512xbf16>, vector<512x384xbf16>, vector<16x384xf32> -> vector<16x384xf32>
    %c0_18 = arith.constant 0 : index
    %c0_19 = arith.constant 0 : index
    %26 = vector.load %arg8[%c0_18, %c0_19] : memref<1x384xf32, #tpu.memory_space<vmem>>, vector<1x384xf32>
    %27 = vector.broadcast %26 : vector<1x384xf32> to vector<16x384xf32>
    %28 = arith.addf %25, %27 : vector<16x384xf32>
    %cst_20 = arith.constant 0.000000e+00 : f32
    %29 = vector.broadcast %cst_20 : f32 to vector<16x384xf32>
    %30 = arith.maximumf %28, %29 : vector<16x384xf32>
    %c0_21 = arith.constant 0 : index
    %c0_22 = arith.constant 0 : index
    %31 = vector.load %arg9[%c0_21, %c0_22] : memref<1x384xf32, #tpu.memory_space<vmem>>, vector<1x384xf32>
    %32 = vector.broadcast %31 : vector<1x384xf32> to vector<16x384xf32>
    %33 = arith.mulf %23, %32 : vector<16x384xf32>
    %cst_23 = arith.constant dense<0.000000e+00> : vector<16xf32>
    %34 = vector.multi_reduction <add>, %33, %cst_23 [1] : vector<16x384xf32> to vector<16xf32>
    %35 = vector.shape_cast %34 : vector<16xf32> to vector<16x1xf32>
    %c0_24 = arith.constant 0 : index
    %c0_25 = arith.constant 0 : index
    %36 = vector.load %arg10[%c0_24, %c0_25] : memref<1x384xf32, #tpu.memory_space<vmem>>, vector<1x384xf32>
    %37 = vector.broadcast %36 : vector<1x384xf32> to vector<16x384xf32>
    %38 = arith.mulf %30, %37 : vector<16x384xf32>
    %cst_26 = arith.constant dense<0.000000e+00> : vector<16xf32>
    %39 = vector.multi_reduction <add>, %38, %cst_26 [1] : vector<16x384xf32> to vector<16xf32>
    %40 = vector.shape_cast %39 : vector<16xf32> to vector<16x1xf32>
    %41 = tpu.concatenate %35, %40 in 1 : vector<16x1xf32>, vector<16x1xf32> -> vector<16x2xf32>
    %c0_27 = arith.constant 0 : index
    %c0_28 = arith.constant 0 : index
    %42 = vector.load %arg11[%c0_27, %c0_28] : memref<1x2xf32, #tpu.memory_space<vmem>>, vector<1x2xf32>
    %43 = vector.broadcast %42 : vector<1x2xf32> to vector<16x2xf32>
    %44 = arith.addf %41, %43 : vector<16x2xf32>
    %c0_29 = arith.constant 0 : index
    %c0_30 = arith.constant 0 : index
    %45 = vector.load %arg12[%c0_29, %c0_30] : memref<16x2xf32, #tpu.memory_space<vmem>>, vector<16x2xf32>
    tpu.vector_store %arg12[%c0_29, %c0_30], %44 {strides = array<i32>} : memref<16x2xf32, #tpu.memory_space<vmem>>, vector<16x2xf32>,
    return
  }
  func.func @transform_0(%arg0: i32) -> (i32, i32) {
    %c0_i32 = arith.constant 0 : i32
    %c0_i32_0 = arith.constant 0 : i32
    return %arg0, %c0_i32 : i32, i32
  }
  func.func @transform_1(%arg0: i32) -> (i32, i32) {
    %c0_i32 = arith.constant 0 : i32
    %c0_i32_0 = arith.constant 0 : i32
    return %arg0, %c0_i32 : i32, i32
  }
  func.func @transform_2(%arg0: i32) -> (i32, i32) {
    %c0_i32 = arith.constant 0 : i32
    %c0_i32_0 = arith.constant 0 : i32
    %c0_i32_1 = arith.constant 0 : i32
    return %c0_i32, %c0_i32_0 : i32, i32
  }
  func.func @transform_3(%arg0: i32) -> (i32, i32) {
    %c0_i32 = arith.constant 0 : i32
    %c0_i32_0 = arith.constant 0 : i32
    %c0_i32_1 = arith.constant 0 : i32
    return %c0_i32, %c0_i32_0 : i32, i32
  }
  func.func @transform_4(%arg0: i32) -> (i32, i32) {
    %c0_i32 = arith.constant 0 : i32
    %c0_i32_0 = arith.constant 0 : i32
    %c0_i32_1 = arith.constant 0 : i32
    return %c0_i32, %c0_i32_0 : i32, i32
  }
  func.func @transform_5(%arg0: i32) -> (i32, i32) {
    %c0_i32 = arith.constant 0 : i32
    %c0_i32_0 = arith.constant 0 : i32
    %c0_i32_1 = arith.constant 0 : i32
    return %c0_i32, %c0_i32_0 : i32, i32
  }
  func.func @transform_6(%arg0: i32) -> (i32, i32) {
    %c0_i32 = arith.constant 0 : i32
    %c0_i32_0 = arith.constant 0 : i32
    %c0_i32_1 = arith.constant 0 : i32
    return %c0_i32, %c0_i32_0 : i32, i32
  }
  func.func @transform_7(%arg0: i32) -> (i32, i32) {
    %c0_i32 = arith.constant 0 : i32
    %c0_i32_0 = arith.constant 0 : i32
    %c0_i32_1 = arith.constant 0 : i32
    return %c0_i32, %c0_i32_0 : i32, i32
  }
  func.func @transform_8(%arg0: i32) -> (i32, i32) {
    %c0_i32 = arith.constant 0 : i32
    %c0_i32_0 = arith.constant 0 : i32
    %c0_i32_1 = arith.constant 0 : i32
    return %c0_i32, %c0_i32_0 : i32, i32
  }
  func.func @transform_9(%arg0: i32) -> (i32, i32) {
    %c0_i32 = arith.constant 0 : i32
    %c0_i32_0 = arith.constant 0 : i32
    %c0_i32_1 = arith.constant 0 : i32
    return %c0_i32, %c0_i32_0 : i32, i32
  }
  func.func @transform_10(%arg0: i32) -> (i32, i32) {
    %c0_i32 = arith.constant 0 : i32
    %c0_i32_0 = arith.constant 0 : i32
    %c0_i32_1 = arith.constant 0 : i32
    return %c0_i32, %c0_i32_0 : i32, i32
  }
  func.func @transform_11(%arg0: i32) -> (i32, i32) {
    %c0_i32 = arith.constant 0 : i32
    %c0_i32_0 = arith.constant 0 : i32
    return %arg0, %c0_i32 : i32, i32
  }
}

</mosaic_0001>

<bundles_post_ra>
// kernel: tpu_custom_call.1
= control target key start
LH: loop header
LB: loop body
LE: loop exit
PB: predicated region body
PF: predicated region fallthrough
CT: control target
= control target key end

     0   :  { %16 = vsyncpa [#allocation3], 0  ;;  %s3317_s0 = inlined_call_operand.vmem [shape: f32[16,8], index: 0, kind: input, shape index: {}]   ;;  %s3318_s1 = inlined_call_operand.vmem [shape: f32[16,4], index: 1, kind: input, shape index: {}]   ;;  %s3319_s2 = inlined_call_operand.hbm [shape: bf16[16,1024], index: 2, kind: input, shape index: {}]   ;;  %s3320_s3 = inlined_call_operand.vmem [shape: f32[1,1024], index: 3, kind: input, shape index: {}]   ;;  %s3321_s4 = inlined_call_operand.hbm [shape: bf16[512,384], index: 4, kind: input, shape index: {}]   ;;  %s3322_s5 = inlined_call_operand.vmem [shape: f32[1,384], index: 5, kind: input, shape index: {}]   ;;  %s3323_s6 = inlined_call_operand.hbm [shape: bf16[512,384], index: 6, kind: input, shape index: {}]   ;;  %s3324_s7 = inlined_call_operand.vmem [shape: f32[1,384], index: 7, kind: input, shape index: {}]   ;;  %s3325_s8 = inlined_call_operand.vmem [shape: f32[1,384], index: 8, kind: input, shape index: {}]   ;;  %s3326_s9 = inlined_call_operand.vmem [shape: f32[1,384], index: 9, kind: input, shape index: {}]   ;;  %s3327_s10 = inlined_call_operand.vmem [shape: f32[1,2], index: 10, kind: input, shape index: {}]   ;;  %s3328_s11 = inlined_call_operand.vmem [shape: f32[16,2], index: 11, kind: output, shape index: {}]  }
   0x1   :  { %17 = vsyncpa [#allocation5], 0  ;;  %s41_s19 = sshll.u32 %s3321_s4, 4  ;;  %s3117_s20 = smov [#allocation4]   ;;  %s42_s19 = int_to_ptr.hbm [resolvable:$true] %s41_s19 }
   0x2   :  { %s43_s21 = sshll.u32 %s3117_s20, 4  ;;  %s26_s24 = sshll.u32 %s3319_s2, 4  ;;  %s44_s21 = int_to_ptr.vmem [resolvable:$true] %s43_s21  ;;  %s27_s24 = int_to_ptr.hbm [resolvable:$true] %s26_s24 }
   0x3   :  { %s3118_s25 = smov 192   ;;  %s3119_s26 = smov 12  }
   0x4   :  { %49 = dma.hbm_to_vmem [thread:$0]  %s42_s19, 12288, %s44_s21, [#allocation5], %s3118_s25, %s3118_s25, %s3119_s26  }
   0x5   :  { %s3120_s27 = smov [#allocation2]   ;;  %s3121_s29 = smov 512  }
   0x6   :  { %s28_s28 = sshll.u32 %s3120_s27, 4  ;;  %s3122_s30 = smov 32   ;;  %s29_s28 = int_to_ptr.vmem [resolvable:$true] %s28_s28 }
   0x7   :  { %34 = dma.hbm_to_vmem [thread:$0]  %s27_s24, 1024, %s29_s28, [#allocation3], %s3121_s29, %s3121_s29, %s3122_s30  }
   0x8   :  { %s56_s13 = sshll.u32 %s3323_s6, 4  ;;  %s3123_s14 = smov [#allocation6]   ;;  %s57_s13 = int_to_ptr.hbm [resolvable:$true] %s56_s13 }
   0x9   :  { %s58_s15 = sshll.u32 %s3123_s14, 4  ;;  %s59_s15 = int_to_ptr.vmem [resolvable:$true] %s58_s15 }
   0xa   :  { %64 = dma.hbm_to_vmem [thread:$0]  %s57_s13, 12288, %s59_s15, [#allocation5], %s3118_s25, %s3118_s25, %s3119_s26  }
   0xb   :  { %3113 = dma.done.wait [#allocation3], 1024  }
   0xc   :  { %3114 = vsyncadd [#allocation3], 4294966272 }
   0xd   :  { %3115 = dma.done.wait [#allocation5], 24576  }
   0xe   :  { %3116 = vsyncadd [#allocation5], 4294942720  ;;  %v90_v0 = vld [vmem:[%s3318_s1] sm:$0xff]  ;;  %v91_v1 = vld [vmem:[%s3318_s1 + $0x8] sm:$0xff]  ;;  %s3124_s1 = smov 8   ;;  %vm106_vm0 = vcmask 64512  }
   0xf   :  { %v2026_v2 = vld [vmem:[#allocation2] sm:$0xf]  ;;  %v92_v3 = vpack.c.bf16 %v90_v0, %v90_v0  ;;  %v93_v4 = vpack.c.bf16 %v91_v1, %v91_v1  ;;  %v2832_v6 = vld [vmem:[#allocation2 + $0x4] sm:$0xf]  ;;  %v2034_v10 = vld [vmem:[#allocation2 + $0x8] sm:$0xf] }
  0x10   :  { %v2836_v5 = vld [vmem:[#allocation2 + $0x1c] sm:$0xf0]  ;;  %v2028_v7 = vld [vmem:[#allocation2 + $0x20] sm:$0xf0]  ;;  %v2837_v11 = vld [vmem:[#allocation2 + $0x24] sm:$0xf0] }
  0x11   :  { %v2027_v8 = vor.u32 %v2836_v5, %v2026_v2  ;;  %v2031_v9 = vor.u32 %v2832_v6, %v2028_v7  ;;  %v2833_v12 = vld [vmem:[#allocation2 + $0xc] sm:$0xf]  ;;  %v101_v13 = vunpack.c.l.b16 %v92_v3  ;;  %v102_v14 = vunpack.c.l.b16 %v93_v4  ;;  %v2042_v19 = vld [vmem:[#allocation2 + $0x10] sm:$0xf]  ;;  %v2834_v21 = vld [vmem:[#allocation2 + $0x14] sm:$0xf] }
  0x12   :  { %v2035_v15 = vor.u32 %v2837_v11, %v2034_v10  ;;  %v2036_v16 = vld [vmem:[#allocation2 + $0x28] sm:$0xf0]  ;;  %v2838_v20 = vld [vmem:[#allocation2 + $0x2c] sm:$0xf0]  ;;  %v2044_v23 = vld [vmem:[#allocation2 + $0x30] sm:$0xf0] }
  0x13   :  { %189 = vmatpush.bf16.msra.mxu0 %v2027_v8  ;;  %203 = vmatpush.bf16.msra.mxu1 %v2031_v9  ;;  %v2039_v17 = vor.u32 %v2833_v12, %v2036_v16  ;;  %v103_v18 = vpack.c.b16 %v102_v14, %v101_v13  ;;  %v2043_v22 = vor.u32 %v2838_v20, %v2042_v19  ;;  %v2050_v24 = vld [vmem:[#allocation2 + $0x18] sm:$0xf]  ;;  %v2835_v28 = vld [vmem:[#allocation2 + $0x1c] sm:$0xf]  ;;  %v86_v31 = vld [vmem:[%s3317_s0] sm:$0xff]  ;;  %vm110_vm1 = vcmask 97280  }
  0x14   :  { %217 = vmatpush.bf16.msra.mxu2 %v2035_v15  ;;  %v2839_v25 = vld [vmem:[#allocation2 + $0x34] sm:$0xf0]  ;;  %v2047_v26 = vor.u32 %v2834_v21, %v2044_v23  ;;  %v2052_v29 = vld [vmem:[#allocation2 + $0x38] sm:$0xf0]  ;;  %v87_v32 = vld [vmem:[%s3317_s0 + $0x8] sm:$0xff]  ;;  %v88_v33 = vpack.c.bf16 %v86_v31, %v86_v31  ;;  %vm179_vm2 = vcmask 130048  }
  0x15   :  { %231 = vmatpush.bf16.msra.mxu3 %v2039_v17  ;;  %104 = vrot.lane.b32.xlu0 %v103_v18, %s3124_s1  ;;  %v2051_v27 = vor.u32 %v2839_v25, %v2050_v24  ;;  %v2055_v30 = vor.u32 %v2835_v28, %v2052_v29  ;;  %v89_v34 = vpack.c.bf16 %v87_v32, %v87_v32  ;;  %v2150_v38 = vld [vmem:[#allocation4 + $0xa8] sm:$0xf]  ;;  %v2862_v39 = vld [vmem:[#allocation4 + $0xb0] sm:$0xf0]  ;;  %v2138_v50 = vld [vmem:[#allocation4 + $0x90] sm:$0xf] }
  0x16   :  { %v96_v35 = vunpack.c.l.b16 %v88_v33  ;;  %v2246_v40 = vld [vmem:[#allocation4 + $0x168] sm:$0xf]  ;;  %v2886_v41 = vld [vmem:[#allocation4 + $0x170] sm:$0xf0]  ;;  %v2151_v48 = vor.u32 %v2862_v39, %v2150_v38  ;;  %v2859_v51 = vld [vmem:[#allocation4 + $0x98] sm:$0xf0] }
  0x17   :  { %245 = vmatpush.bf16.msrb.mxu0 %v2043_v22  ;;  %259 = vmatpush.bf16.msrb.mxu1 %v2047_v26  ;;  %v97_v36 = vunpack.c.l.b16 %v89_v34  ;;  %v2342_v42 = vld [vmem:[#allocation4 + $0x228] sm:$0xf]  ;;  %v2910_v43 = vld [vmem:[#allocation4 + $0x230] sm:$0xf0]  ;;  %v2247_v49 = vor.u32 %v2886_v41, %v2246_v40  ;;  %v2234_v52 = vld [vmem:[#allocation4 + $0x150] sm:$0xf]  ;;  %v2139_v61 = vor.u32 %v2859_v51, %v2138_v50 }
  0x18   :  { %273 = vmatpush.bf16.msrb.mxu2 %v2051_v27  ;;  %v2438_v44 = vld [vmem:[#allocation4 + $0x2e8] sm:$0xf]  ;;  %v2934_v45 = vld [vmem:[#allocation4 + $0x2f0] sm:$0xf0]  ;;  %v2883_v54 = vld [vmem:[#allocation4 + $0x158] sm:$0xf0]  ;;  %v2343_v55 = vor.u32 %v2910_v43, %v2342_v42 }
  0x19   :  { %287 = vmatpush.bf16.msrb.mxu3 %v2055_v30  ;;  %v98_v37 = vpack.c.b16 %v97_v36, %v96_v35  ;;  %v2439_v56 = vor.u32 %v2934_v45, %v2438_v44  ;;  %v2330_v57 = vld [vmem:[#allocation4 + $0x210] sm:$0xf]  ;;  %v2907_v58 = vld [vmem:[#allocation4 + $0x218] sm:$0xf0]  ;;  %v2235_v62 = vor.u32 %v2883_v54, %v2234_v52  ;;  %v2126_v63 = vld [vmem:[#allocation4 + $0x78] sm:$0xf] }
  0x1a   :  { %v2426_v59 = vld [vmem:[#allocation4 + $0x2d0] sm:$0xf]  ;;  %v2931_v60 = vld [vmem:[#allocation4 + $0x2d8] sm:$0xf0]  ;;  %v2856_v0 = vld [vmem:[#allocation4 + $0x80] sm:$0xf0]  ;;  %v2331_v3 = vor.u32 %v2907_v58, %v2330_v57 }
  0x1b   :  { %v2222_v1 = vld [vmem:[#allocation4 + $0x138] sm:$0xf]  ;;  %v2880_v2 = vld [vmem:[#allocation4 + $0x140] sm:$0xf0]  ;;  %v2427_v4 = vor.u32 %v2931_v60, %v2426_v59  ;;  %v2127_v9 = vor.u32 %v2856_v0, %v2126_v63  ;;  %v2114_v11 = vld [vmem:[#allocation4 + $0x60] sm:$0xf] }
  0x1c   :  { %v2318_v5 = vld [vmem:[#allocation4 + $0x1f8] sm:$0xf]  ;;  %v2904_v6 = vld [vmem:[#allocation4 + $0x200] sm:$0xf0]  ;;  %v2223_v10 = vor.u32 %v2880_v2, %v2222_v1  ;;  %v2853_v12 = vld [vmem:[#allocation4 + $0x68] sm:$0xf0] }
  0x1d   :  { %v2414_v7 = vld [vmem:[#allocation4 + $0x2b8] sm:$0xf]  ;;  %v2928_v8 = vld [vmem:[#allocation4 + $0x2c0] sm:$0xf0]  ;;  %v2210_v13 = vld [vmem:[#allocation4 + $0x120] sm:$0xf]  ;;  %v2319_v15 = vor.u32 %v2904_v6, %v2318_v5  ;;  %v2115_v21 = vor.u32 %v2853_v12, %v2114_v11 }
  0x1e   :  { %v2877_v14 = vld [vmem:[#allocation4 + $0x128] sm:$0xf0]  ;;  %v2415_v16 = vor.u32 %v2928_v8, %v2414_v7  ;;  %v2306_v17 = vld [vmem:[#allocation4 + $0x1e0] sm:$0xf]  ;;  %v2102_v23 = vld [vmem:[#allocation4 + $0x48] sm:$0xf] }
  0x1f   :  { %v2901_v18 = vld [vmem:[#allocation4 + $0x1e8] sm:$0xf0]  ;;  %v2402_v19 = vld [vmem:[#allocation4 + $0x2a0] sm:$0xf]  ;;  %v2211_v22 = vor.u32 %v2877_v14, %v2210_v13  ;;  %v2850_v24 = vld [vmem:[#allocation4 + $0x50] sm:$0xf0] }
  0x20   :  { %v2925_v20 = vld [vmem:[#allocation4 + $0x2a8] sm:$0xf0]  ;;  %v2198_v25 = vld [vmem:[#allocation4 + $0x108] sm:$0xf]  ;;  %v2874_v26 = vld [vmem:[#allocation4 + $0x110] sm:$0xf0]  ;;  %v2307_v27 = vor.u32 %v2901_v18, %v2306_v17  ;;  %v2103_v33 = vor.u32 %v2850_v24, %v2102_v23 }
  0x21   :  { %v2403_v28 = vor.u32 %v2925_v20, %v2402_v19  ;;  %v2294_v29 = vld [vmem:[#allocation4 + $0x1c8] sm:$0xf]  ;;  %v2898_v30 = vld [vmem:[#allocation4 + $0x1d0] sm:$0xf0]  ;;  %v2199_v34 = vor.u32 %v2874_v26, %v2198_v25  ;;  %v2090_v35 = vld [vmem:[#allocation4 + $0x30] sm:$0xf] }
  0x22   :  { %v2390_v31 = vld [vmem:[#allocation4 + $0x288] sm:$0xf]  ;;  %v2922_v32 = vld [vmem:[#allocation4 + $0x290] sm:$0xf0]  ;;  %v2847_v36 = vld [vmem:[#allocation4 + $0x38] sm:$0xf0]  ;;  %v2295_v39 = vor.u32 %v2898_v30, %v2294_v29 }
  0x23   :  { %v2871_v38 = vld [vmem:[#allocation4 + $0xf8] sm:$0xf0]  ;;  %v2391_v40 = vor.u32 %v2922_v32, %v2390_v31  ;;  %v2282_v41 = vld [vmem:[#allocation4 + $0x1b0] sm:$0xf]  ;;  %v2091_v45 = vor.u32 %v2847_v36, %v2090_v35  ;;  %v2868_v50 = vld [vmem:[#allocation4 + $0xe0] sm:$0xf0] }
  0x24   :  { %v2895_v42 = vld [vmem:[#allocation4 + $0x1b8] sm:$0xf0]  ;;  %v2378_v43 = vld [vmem:[#allocation4 + $0x270] sm:$0xf]  ;;  %v2270_v54 = vld [vmem:[#allocation4 + $0x198] sm:$0xf] }
  0x25   :  { %v2919_v44 = vld [vmem:[#allocation4 + $0x278] sm:$0xf0]  ;;  %v2283_v51 = vor.u32 %v2895_v42, %v2282_v41  ;;  %v2916_v57 = vld [vmem:[#allocation4 + $0x260] sm:$0xf0]  ;;  %v2066_v58 = vld [vmem:[#allocation4] sm:$0xf] }
  0x26   :  { %v2379_v52 = vor.u32 %v2919_v44, %v2378_v43  ;;  %v2841_v60 = vld [vmem:[#allocation4 + $0x8] sm:$0xf0]  ;;  %v2152_v0 = vld [vmem:[#allocation4 + $0xb4] sm:$0xf0]  ;;  %v2258_v5 = vld [vmem:[#allocation4 + $0x180] sm:$0xf] }
  0x27   :  { %v2861_v63 = vld [vmem:[#allocation4 + $0xac] sm:$0xf]  ;;  %v2354_v7 = vld [vmem:[#allocation4 + $0x240] sm:$0xf]  ;;  %v2344_v12 = vld [vmem:[#allocation4 + $0x234] sm:$0xf0] }
  0x28   :  { %v2885_v1 = vld [vmem:[#allocation4 + $0x16c] sm:$0xf]  ;;  %v2440_v14 = vld [vmem:[#allocation4 + $0x2f4] sm:$0xf0]  ;;  %v2858_v17 = vld [vmem:[#allocation4 + $0x94] sm:$0xf] }
  0x29   :  { %v2889_v6 = vld [vmem:[#allocation4 + $0x188] sm:$0xf0]  ;;  %v2140_v18 = vld [vmem:[#allocation4 + $0x9c] sm:$0xf0]  ;;  %v2882_v19 = vld [vmem:[#allocation4 + $0x154] sm:$0xf] }
  0x2a   :  { %v2913_v8 = vld [vmem:[#allocation4 + $0x248] sm:$0xf0]  ;;  %v2236_v20 = vld [vmem:[#allocation4 + $0x15c] sm:$0xf0]  ;;  %v2906_v25 = vld [vmem:[#allocation4 + $0x214] sm:$0xf]  ;;  %v2143_v29 = vor.u32 %v2858_v17, %v2140_v18 }
  0x2b   :  { %v2933_v13 = vld [vmem:[#allocation4 + $0x2ec] sm:$0xf]  ;;  %v2332_v26 = vld [vmem:[#allocation4 + $0x21c] sm:$0xf0]  ;;  %v2239_v30 = vor.u32 %v2882_v19, %v2236_v20  ;;  %v2855_v31 = vld [vmem:[#allocation4 + $0x7c] sm:$0xf] }
  0x2c   :  { %v2443_v24 = vor.u32 %v2933_v13, %v2440_v14  ;;  %v2128_v32 = vld [vmem:[#allocation4 + $0x84] sm:$0xf0]  ;;  %v2335_v35 = vor.u32 %v2906_v25, %v2332_v26  ;;  %v2876_v41 = vld [vmem:[#allocation4 + $0x124] sm:$0xf]  ;;  %v2212_v42 = vld [vmem:[#allocation4 + $0x12c] sm:$0xf0] }
  0x2d   :  { %v2215_v44 = vor.u32 %v2876_v41, %v2212_v42  ;;  %v2867_v13 = vld [vmem:[#allocation4 + $0xdc] sm:$0xf]  ;;  %v2894_v17 = vld [vmem:[#allocation4 + $0x1b4] sm:$0xf]  ;;  %v2284_v18 = vld [vmem:[#allocation4 + $0x1bc] sm:$0xf0] }
  0x2e   :  { %v2918_v19 = vld [vmem:[#allocation4 + $0x274] sm:$0xf]  ;;  %v2287_v20 = vor.u32 %v2894_v17, %v2284_v18  ;;  %v2864_v25 = vld [vmem:[#allocation4 + $0xc4] sm:$0xf]  ;;  %vm2006_vm3 = vcmask 7168   ;;  %vm2015_vm4 = vcmask 15360  }
  0x2f   :  { %v3228_v41 = vld [vmem:[%s3320_s3] sm:$0xff] }
  0x87   :  { %v105_v46 = vpop.permute.xlu0 %104 }
  0x88   :  { %v109_v47 = vsel %vm106_vm0, %v98_v37, %v105_v46  ;;  %v2186_v37 = vld [vmem:[#allocation4 + $0xf0] sm:$0xf] }
  0x89   :  { %v3207_v53 = vsel %vm110_vm1, %v109_v47, 0  ;;  %v2187_v46 = vor.u32 %v2871_v38, %v2186_v37  ;;  %v2078_v47 = vld [vmem:[#allocation4 + $0x18] sm:$0xf]  ;;  %v2131_v37 = vor.u32 %v2855_v31, %v2128_v32  ;;  %v2915_v31 = vld [vmem:[#allocation4 + $0x25c] sm:$0xf] }
  0x8a   :  { %2056 = vmatmul.msk.bf16.vlgmr.msra.gmra.mxu0 %vm179_vm2, %v3207_v53  ;;  %2057 = vmatmul.msk.bf16.vlgmr.msra.gmra.mxu1 %vm179_vm2, %v3207_v53  ;;  %v2368_v32 = vld [vmem:[#allocation4 + $0x264] sm:$0xf0] }
  0x8b   :  { %2058 = vmatmul.msk.bf16.vlgmr.msra.gmra.mxu2 %vm179_vm2, %v3207_v53  ;;  %2059 = vmatmul.msk.bf16.vlgmr.msra.gmra.mxu3 %vm179_vm2, %v3207_v53 }
  0x8c   :  { %966 = vmatpush.bf16.msra.mxu0 %v2151_v48  ;;  %980 = vmatpush.bf16.msra.mxu1 %v2247_v49  ;;  %v2844_v48 = vld [vmem:[#allocation4 + $0x20] sm:$0xf0]  ;;  %v2174_v49 = vld [vmem:[#allocation4 + $0xd8] sm:$0xf] }
  0x8d   :  { %994 = vmatpush.bf16.msra.mxu2 %v2343_v55  ;;  %1008 = vmatpush.bf16.msra.mxu3 %v2439_v56  ;;  %v2892_v55 = vld [vmem:[#allocation4 + $0x1a0] sm:$0xf0]  ;;  %v2366_v56 = vld [vmem:[#allocation4 + $0x258] sm:$0xf]  ;;  %v2175_v59 = vor.u32 %v2868_v50, %v2174_v49  ;;  %v2416_v49 = vld [vmem:[#allocation4 + $0x2c4] sm:$0xf0] }
  0x8e   :  { %v2271_v2 = vor.u32 %v2892_v55, %v2270_v54  ;;  %v2873_v55 = vld [vmem:[#allocation4 + $0x10c] sm:$0xf] }
  0x90   :  { %967 = vmatpush.bf16.msra.mxu0 %v2139_v61  ;;  %981 = vmatpush.bf16.msra.mxu1 %v2235_v62  ;;  %v2162_v61 = vld [vmem:[#allocation4 + $0xc0] sm:$0xf]  ;;  %v2865_v62 = vld [vmem:[#allocation4 + $0xc8] sm:$0xf0] }
  0x91   :  { %995 = vmatpush.bf16.msra.mxu2 %v2331_v3  ;;  %1009 = vmatpush.bf16.msra.mxu3 %v2427_v4  ;;  %v2367_v3 = vor.u32 %v2916_v57, %v2366_v56  ;;  %v2248_v4 = vld [vmem:[#allocation4 + $0x174] sm:$0xf0]  ;;  %v2163_v11 = vor.u32 %v2865_v62, %v2162_v61  ;;  %v2404_v61 = vld [vmem:[#allocation4 + $0x2ac] sm:$0xf0] }
  0x92   :  { %v2200_v56 = vld [vmem:[#allocation4 + $0x114] sm:$0xf0] }
  0x93   :  { %v2203_v57 = vor.u32 %v2873_v55, %v2200_v56  ;;  %v2863_v56 = vld [vmem:[#allocation4 + $0xb8] sm:$0xf0] }
  0x94   :  { %968 = vmatpush.bf16.msra.mxu0 %v2127_v9  ;;  %982 = vmatpush.bf16.msra.mxu1 %v2223_v10  ;;  %v2909_v9 = vld [vmem:[#allocation4 + $0x22c] sm:$0xf]  ;;  %v2067_v10 = vor.u32 %v2841_v60, %v2066_v58  ;;  %v2900_v58 = vld [vmem:[#allocation4 + $0x1e4] sm:$0xf] }
  0x95   :  { %996 = vmatpush.bf16.msra.mxu2 %v2319_v15  ;;  %1010 = vmatpush.bf16.msra.mxu3 %v2415_v16  ;;  %v2155_v15 = vor.u32 %v2861_v63, %v2152_v0  ;;  %v2251_v16 = vor.u32 %v2885_v1, %v2248_v4  ;;  %v2347_v23 = vor.u32 %v2909_v9, %v2344_v12  ;;  %v2846_v63 = vld [vmem:[#allocation4 + $0x34] sm:$0xf]  ;;  %v2092_v0 = vld [vmem:[#allocation4 + $0x3c] sm:$0xf0]  ;;  %v2392_v9 = vld [vmem:[#allocation4 + $0x294] sm:$0xf0] }
  0x96   :  { %v2870_v1 = vld [vmem:[#allocation4 + $0xf4] sm:$0xf]  ;;  %v2080_v12 = vld [vmem:[#allocation4 + $0x24] sm:$0xf0] }
  0x98   :  { %969 = vmatpush.bf16.msra.mxu0 %v2115_v21  ;;  %983 = vmatpush.bf16.msra.mxu1 %v2211_v22  ;;  %v2259_v21 = vor.u32 %v2889_v6, %v2258_v5  ;;  %v2355_v22 = vor.u32 %v2913_v8, %v2354_v7  ;;  %v2897_v5 = vld [vmem:[#allocation4 + $0x1cc] sm:$0xf]  ;;  %v2296_v6 = vld [vmem:[#allocation4 + $0x1d4] sm:$0xf0] }
  0x99   :  { %997 = vmatpush.bf16.msra.mxu2 %v2307_v27  ;;  %1011 = vmatpush.bf16.msra.mxu3 %v2403_v28  ;;  %v2930_v27 = vld [vmem:[#allocation4 + $0x2d4] sm:$0xf]  ;;  %v2428_v28 = vld [vmem:[#allocation4 + $0x2dc] sm:$0xf0]  ;;  %v2299_v7 = vor.u32 %v2897_v5, %v2296_v6  ;;  %v2921_v8 = vld [vmem:[#allocation4 + $0x28c] sm:$0xf] }
  0x9a   :  { %2060 = vmatmul.msk.bf16.vlgmr.msrb.gmra.mxu0 %vm179_vm2, %v3207_v53  ;;  %2061 = vmatmul.msk.bf16.vlgmr.msrb.gmra.mxu1 %vm179_vm2, %v3207_v53  ;;  %v2431_v36 = vor.u32 %v2930_v27, %v2428_v28  ;;  %v2164_v27 = vld [vmem:[#allocation4 + $0xcc] sm:$0xf0]  ;;  %v2242_v6 = vld [vmem:[#allocation4 + $0x158] sm:$0xf] }
  0x9b   :  { %2062 = vmatmul.msk.bf16.vlgmr.msrb.gmra.mxu2 %vm179_vm2, %v3207_v53  ;;  %2063 = vmatmul.msk.bf16.vlgmr.msrb.gmra.mxu3 %vm179_vm2, %v3207_v53  ;;  %v2079_v53 = vor.u32 %v2844_v48, %v2078_v47  ;;  %v2927_v47 = vld [vmem:[#allocation4 + $0x2bc] sm:$0xf]  ;;  %v2167_v28 = vor.u32 %v2864_v25, %v2164_v27 }
  0x9c   :  { %970 = vmatpush.bf16.msra.mxu0 %v2103_v33  ;;  %984 = vmatpush.bf16.msra.mxu1 %v2199_v34  ;;  %v2879_v33 = vld [vmem:[#allocation4 + $0x13c] sm:$0xf]  ;;  %v2224_v34 = vld [vmem:[#allocation4 + $0x144] sm:$0xf0]  ;;  %v2419_v50 = vor.u32 %v2927_v47, %v2416_v49 }
  0x9d   :  { %998 = vmatpush.bf16.msra.mxu2 %v2295_v39  ;;  %1012 = vmatpush.bf16.msra.mxu3 %v2391_v40  ;;  %v2227_v38 = vor.u32 %v2879_v33, %v2224_v34  ;;  %v2852_v39 = vld [vmem:[#allocation4 + $0x64] sm:$0xf]  ;;  %v2116_v40 = vld [vmem:[#allocation4 + $0x6c] sm:$0xf0]  ;;  %v2371_v34 = vor.u32 %v2915_v31, %v2368_v32  ;;  %v2338_v31 = vld [vmem:[#allocation4 + $0x218] sm:$0xf] }
  0x9e   :  { %v2119_v43 = vor.u32 %v2852_v39, %v2116_v40  ;;  %v2356_v39 = vld [vmem:[#allocation4 + $0x24c] sm:$0xf0]  ;;  %v2908_v32 = vld [vmem:[#allocation4 + $0x220] sm:$0xf0] }
  0xa0   :  { %971 = vmatpush.bf16.msra.mxu0 %v2091_v45  ;;  %985 = vmatpush.bf16.msra.mxu1 %v2187_v46  ;;  %v2903_v45 = vld [vmem:[#allocation4 + $0x1fc] sm:$0xf]  ;;  %v2320_v46 = vld [vmem:[#allocation4 + $0x204] sm:$0xf0] }
  0xa1   :  { %999 = vmatpush.bf16.msra.mxu2 %v2283_v51  ;;  %1013 = vmatpush.bf16.msra.mxu3 %v2379_v52  ;;  %v2323_v48 = vor.u32 %v2903_v45, %v2320_v46  ;;  %v2849_v51 = vld [vmem:[#allocation4 + $0x4c] sm:$0xf]  ;;  %v2104_v52 = vld [vmem:[#allocation4 + $0x54] sm:$0xf0]  ;;  %v124_v45 = vperm.slane %v3228_v41, 1 }
  0xa2   :  { %v2107_v54 = vor.u32 %v2849_v51, %v2104_v52  ;;  %v2158_v52 = vld [vmem:[#allocation4 + $0xb0] sm:$0xf] }
  0xa4   :  { %972 = vmatpush.bf16.msra.mxu0 %v2079_v53  ;;  %986 = vmatpush.bf16.msra.mxu1 %v2175_v59  ;;  %v2308_v53 = vld [vmem:[#allocation4 + $0x1ec] sm:$0xf0]  ;;  %v2924_v59 = vld [vmem:[#allocation4 + $0x2a4] sm:$0xf] }
  0xa5   :  { %1000 = vmatpush.bf16.msra.mxu2 %v2271_v2  ;;  %1014 = vmatpush.bf16.msra.mxu3 %v2367_v3  ;;  %v2311_v60 = vor.u32 %v2900_v58, %v2308_v53  ;;  %v2407_v62 = vor.u32 %v2924_v59, %v2404_v61  ;;  %v2095_v2 = vor.u32 %v2846_v63, %v2092_v0  ;;  %v2188_v3 = vld [vmem:[#allocation4 + $0xfc] sm:$0xf0]  ;;  %v2887_v58 = vld [vmem:[#allocation4 + $0x178] sm:$0xf0]  ;;  %v125_v53 = vperm.slane %v3228_v41, 2 }
  0xa6   :  { %v2191_v4 = vor.u32 %v2870_v1, %v2188_v3  ;;  %v126_v59 = vperm.slane %v3228_v41, 3  ;;  %v2159_v0 = vor.u32 %v2863_v56, %v2158_v52  ;;  %v2860_v3 = vld [vmem:[#allocation4 + $0xa0] sm:$0xf0]  ;;  %v2851_v52 = vld [vmem:[#allocation4 + $0x58] sm:$0xf0] }
  0xa8   :  { %973 = vmatpush.bf16.msra.mxu0 %v2067_v10  ;;  %987 = vmatpush.bf16.msra.mxu1 %v2163_v11  ;;  %v2395_v10 = vor.u32 %v2921_v8, %v2392_v9  ;;  %v2843_v11 = vld [vmem:[#allocation4 + $0x1c] sm:$0xf] }
  0xa9   :  { %1001 = vmatpush.bf16.msra.mxu2 %v2259_v21  ;;  %1015 = vmatpush.bf16.msra.mxu3 %v2355_v22  ;;  %v2083_v14 = vor.u32 %v2843_v11, %v2080_v12  ;;  %v2380_v21 = vld [vmem:[#allocation4 + $0x27c] sm:$0xf0] }
  0xaa   :  { %v2383_v22 = vor.u32 %v2918_v19, %v2380_v21  ;;  %v2935_v19 = vld [vmem:[#allocation4 + $0x2f8] sm:$0xf0]  ;;  %v2857_v21 = vld [vmem:[#allocation4 + $0x88] sm:$0xf0] }
  0xac   :  { %1022 = vmatpush.bf16.msrb.mxu0 %v2155_v15  ;;  %1036 = vmatpush.bf16.msrb.mxu1 %v2251_v16  ;;  %v2176_v15 = vld [vmem:[#allocation4 + $0xe4] sm:$0xf0] }
  0xad   :  { %1050 = vmatpush.bf16.msrb.mxu2 %v2347_v23  ;;  %1064 = vmatpush.bf16.msrb.mxu3 %v2443_v24  ;;  %v2179_v16 = vor.u32 %v2867_v13, %v2176_v15  ;;  %v2840_v23 = vld [vmem:[#allocation4 + $0x4] sm:$0xf]  ;;  %v2068_v24 = vld [vmem:[#allocation4 + $0xc] sm:$0xf0] }
  0xae   :  { %v2071_v26 = vor.u32 %v2840_v23, %v2068_v24  ;;  %v2350_v13 = vld [vmem:[#allocation4 + $0x230] sm:$0xf]  ;;  %v2881_v23 = vld [vmem:[#allocation4 + $0x148] sm:$0xf0] }
  0xaf   :  { %v2446_v15 = vld [vmem:[#allocation4 + $0x2f0] sm:$0xf] }
  0xb0   :  { %1023 = vmatpush.bf16.msrb.mxu0 %v2143_v29  ;;  %1037 = vmatpush.bf16.msrb.mxu1 %v2239_v30  ;;  %v2891_v29 = vld [vmem:[#allocation4 + $0x19c] sm:$0xf]  ;;  %v2272_v30 = vld [vmem:[#allocation4 + $0x1a4] sm:$0xf0] }
  0xb1   :  { %1051 = vmatpush.bf16.msrb.mxu2 %v2335_v35  ;;  %1065 = vmatpush.bf16.msrb.mxu3 %v2431_v36  ;;  %v2275_v33 = vor.u32 %v2891_v29, %v2272_v30  ;;  %v2888_v35 = vld [vmem:[#allocation4 + $0x184] sm:$0xf]  ;;  %v2260_v36 = vld [vmem:[#allocation4 + $0x18c] sm:$0xf0]  ;;  %v2447_v29 = vor.u32 %v2935_v19, %v2446_v15  ;;  %v2182_v15 = vld [vmem:[#allocation4 + $0xe0] sm:$0xf] }
  0xb2   :  { %v2290_v19 = vld [vmem:[#allocation4 + $0x1b8] sm:$0xf] }
  0xb4   :  { %1024 = vmatpush.bf16.msrb.mxu0 %v2131_v37  ;;  %1038 = vmatpush.bf16.msrb.mxu1 %v2227_v38  ;;  %v2263_v37 = vor.u32 %v2888_v35, %v2260_v36  ;;  %v2912_v38 = vld [vmem:[#allocation4 + $0x244] sm:$0xf]  ;;  %v2434_v36 = vld [vmem:[#allocation4 + $0x2d8] sm:$0xf] }
  0xb5   :  { %1052 = vmatpush.bf16.msrb.mxu2 %v2323_v48  ;;  %1066 = vmatpush.bf16.msrb.mxu3 %v2419_v50  ;;  %v2359_v40 = vor.u32 %v2912_v38, %v2356_v39  ;;  %v2122_v38 = vld [vmem:[#allocation4 + $0x68] sm:$0xf]  ;;  %v2854_v39 = vld [vmem:[#allocation4 + $0x70] sm:$0xf0] }
  0xb8   :  { %1025 = vmatpush.bf16.msrb.mxu0 %v2119_v43  ;;  %1039 = vmatpush.bf16.msrb.mxu1 %v2215_v44  ;;  %v123_v44 = vperm.slane %v3228_v41, 0 }
  0xb9   :  { %1053 = vmatpush.bf16.msrb.mxu2 %v2311_v60  ;;  %1067 = vmatpush.bf16.msrb.mxu3 %v2407_v62 }
  0xbc   :  { %1026 = vmatpush.bf16.msrb.mxu0 %v2107_v54  ;;  %1040 = vmatpush.bf16.msrb.mxu1 %v2203_v57  ;;  %v2254_v57 = vld [vmem:[#allocation4 + $0x170] sm:$0xf] }
  0xbd   :  { %1054 = vmatpush.bf16.msrb.mxu2 %v2299_v7  ;;  %1068 = vmatpush.bf16.msrb.mxu3 %v2395_v10  ;;  %v2255_v1 = vor.u32 %v2887_v58, %v2254_v57  ;;  %v2884_v7 = vld [vmem:[#allocation4 + $0x160] sm:$0xf0]  ;;  %v2314_v58 = vld [vmem:[#allocation4 + $0x1e8] sm:$0xf] }
  0xbe   :  { %v2243_v18 = vor.u32 %v2884_v7, %v2242_v6  ;;  %v2302_v7 = vld [vmem:[#allocation4 + $0x1d0] sm:$0xf] }
  0xc0   :  { %1027 = vmatpush.bf16.msrb.mxu0 %v2095_v2  ;;  %1041 = vmatpush.bf16.msrb.mxu1 %v2191_v4  ;;  %v2146_v2 = vld [vmem:[#allocation4 + $0x98] sm:$0xf] }
  0xc1   :  { %1055 = vmatpush.bf16.msrb.mxu2 %v2287_v20  ;;  %1069 = vmatpush.bf16.msrb.mxu3 %v2383_v22  ;;  %v2147_v12 = vor.u32 %v2860_v3, %v2146_v2  ;;  %v2134_v20 = vld [vmem:[#allocation4 + $0x80] sm:$0xf]  ;;  %v2872_v2 = vld [vmem:[#allocation4 + $0x100] sm:$0xf0] }
  0xc2   :  { %v2230_v22 = vld [vmem:[#allocation4 + $0x140] sm:$0xf]  ;;  %v2135_v30 = vor.u32 %v2857_v21, %v2134_v20  ;;  %v2896_v20 = vld [vmem:[#allocation4 + $0x1c0] sm:$0xf0]  ;;  %v2386_v21 = vld [vmem:[#allocation4 + $0x278] sm:$0xf] }
  0xc3   :  { %v2231_v35 = vor.u32 %v2881_v23, %v2230_v22  ;;  %v2920_v22 = vld [vmem:[#allocation4 + $0x280] sm:$0xf0] }
  0xc4   :  { %1028 = vmatpush.bf16.msrb.mxu0 %v2083_v14  ;;  %1042 = vmatpush.bf16.msrb.mxu1 %v2179_v16  ;;  %v2911_v14 = vld [vmem:[#allocation4 + $0x238] sm:$0xf0] }
  0xc5   :  { %1056 = vmatpush.bf16.msrb.mxu2 %v2275_v33  ;;  %1070 = vmatpush.bf16.msrb.mxu3 %v2371_v34 }
  0xc8   :  { %1029 = vmatpush.bf16.msrb.mxu0 %v2071_v26  ;;  %1043 = vmatpush.bf16.msrb.mxu1 %v2167_v28  ;;  %v2351_v28 = vor.u32 %v2911_v14, %v2350_v13  ;;  %v2086_v13 = vld [vmem:[#allocation4 + $0x20] sm:$0xf]  ;;  %v2845_v14 = vld [vmem:[#allocation4 + $0x28] sm:$0xf0] }
  0xc9   :  { %1057 = vmatpush.bf16.msrb.mxu2 %v2263_v37  ;;  %1071 = vmatpush.bf16.msrb.mxu3 %v2359_v40  ;;  %v2932_v37 = vld [vmem:[#allocation4 + $0x2e0] sm:$0xf0]  ;;  %v2218_v40 = vld [vmem:[#allocation4 + $0x128] sm:$0xf]  ;;  %v2087_v23 = vor.u32 %v2845_v14, %v2086_v13  ;;  %v2498_v14 = vld [vmem:[#allocation6 + $0x60] sm:$0xf] }
 0x107   :  { %v191_v42 = vpop.f32.mrf.mxu0  ;;  %v205_v43 = vpop.f32.mrf.mxu1 }
 0x108   :  { %v192_v46 = vadd.f32 %v191_v42, %v123_v44  ;;  %v206_v47 = vadd.f32 %v205_v43, %v124_v45  ;;  %v2878_v42 = vld [vmem:[#allocation4 + $0x130] sm:$0xf0]  ;;  %v2339_v43 = vor.u32 %v2908_v32, %v2338_v31  ;;  %v2291_v31 = vor.u32 %v2896_v20, %v2290_v19  ;;  %v2702_v19 = vld [vmem:[#allocation6 + $0x1f8] sm:$0xf] }
 0x109   :  { %v2387_v32 = vor.u32 %v2920_v22, %v2386_v21  ;;  %v3000_v21 = vld [vmem:[#allocation6 + $0x200] sm:$0xf0]  ;;  %v2798_v22 = vld [vmem:[#allocation6 + $0x2b8] sm:$0xf] }
 0x10a   :  { %v294_v60 = vmax.f32 %v192_v46, 0.0  ;;  %v295_v61 = vmax.f32 %v206_v47, 0.0  ;;  %v2123_v46 = vor.u32 %v2854_v39, %v2122_v38  ;;  %v2219_v47 = vor.u32 %v2878_v42, %v2218_v40  ;;  %v2893_v38 = vld [vmem:[#allocation4 + $0x1a8] sm:$0xf0]  ;;  %v2374_v39 = vld [vmem:[#allocation4 + $0x260] sm:$0xf] }
 0x10b   :  { %v2917_v40 = vld [vmem:[#allocation4 + $0x268] sm:$0xf0] }
 0x10e   :  { %v219_v48 = vpop.f32.mrf.mxu2  ;;  %v233_v49 = vpop.f32.mrf.mxu3 }
 0x10f   :  { %v193_v50 = vpop.f32.mrf.mxu0  ;;  %v207_v51 = vpop.f32.mrf.mxu1  ;;  %v220_v8 = vadd.f32 %v219_v48, %v125_v53  ;;  %v234_v9 = vadd.f32 %v233_v49, %v126_v59  ;;  %v2905_v48 = vld [vmem:[#allocation4 + $0x208] sm:$0xf0]  ;;  %v2422_v49 = vld [vmem:[#allocation4 + $0x2c0] sm:$0xf] }
 0x110   :  { %v194_v54 = vadd.f32 %v193_v50, %v123_v44  ;;  %v208_v55 = vadd.f32 %v207_v51, %v124_v45  ;;  %v2435_v44 = vor.u32 %v2932_v37, %v2434_v36  ;;  %v2326_v45 = vld [vmem:[#allocation4 + $0x200] sm:$0xf]  ;;  %v2929_v50 = vld [vmem:[#allocation4 + $0x2c8] sm:$0xf0]  ;;  %v2110_v51 = vld [vmem:[#allocation4 + $0x50] sm:$0xf] }
 0x111   :  { %v296_v24 = vmax.f32 %v220_v8, 0.0  ;;  %v297_v25 = vmax.f32 %v234_v9, 0.0  ;;  %v2327_v56 = vor.u32 %v2905_v48, %v2326_v45  ;;  %v2423_v57 = vor.u32 %v2929_v50, %v2422_v49  ;;  %v2899_v8 = vld [vmem:[#allocation4 + $0x1d8] sm:$0xf0]  ;;  %v2398_v9 = vld [vmem:[#allocation4 + $0x290] sm:$0xf] }
 0x112   :  { %v302_v62 = vmax.f32 %v194_v54, 0.0  ;;  %v303_v63 = vmax.f32 %v208_v55, 0.0  ;;  %v2206_v54 = vld [vmem:[#allocation4 + $0x110] sm:$0xf]  ;;  %v2875_v55 = vld [vmem:[#allocation4 + $0x118] sm:$0xf0]  ;;  %v2375_v50 = vor.u32 %v2917_v40, %v2374_v39 }
 0x113   :  { %v2982_v36 = vld [vmem:[#allocation6 + $0x170] sm:$0xf0]  ;;  %v2278_v37 = vld [vmem:[#allocation4 + $0x1a0] sm:$0xf]  ;;  %v2618_v48 = vld [vmem:[#allocation6 + $0x150] sm:$0xf] }
 0x114   :  { %v3234_v4 = vpack.c.bf16 %v302_v62, %v294_v60  ;;  %v3236_v5 = vpack.c.bf16 %v303_v63, %v295_v61  ;;  %v2926_v60 = vld [vmem:[#allocation4 + $0x2b0] sm:$0xf0]  ;;  %v2111_v61 = vor.u32 %v2851_v52, %v2110_v51  ;;  %v2207_v62 = vor.u32 %v2875_v55, %v2206_v54  ;;  %v2098_v63 = vld [vmem:[#allocation4 + $0x38] sm:$0xf]  ;;  %v2979_v51 = vld [vmem:[#allocation6 + $0x158] sm:$0xf0] }
 0x115   :  { %v2279_v49 = vor.u32 %v2893_v38, %v2278_v37  ;;  %v2266_v52 = vld [vmem:[#allocation4 + $0x188] sm:$0xf]  ;;  %v2890_v54 = vld [vmem:[#allocation4 + $0x190] sm:$0xf0]  ;;  %v2997_v37 = vld [vmem:[#allocation6 + $0x1e8] sm:$0xf0] }
 0x116   :  { %v221_v10 = vpop.f32.mrf.mxu2  ;;  %v235_v11 = vpop.f32.mrf.mxu3  ;;  %974 = vmatmul.bf16.vlgmr.msra.gmra.mxu0 %v3234_v4  ;;  %988 = vmatmul.bf16.vlgmr.msra.gmra.mxu1 %v3236_v5  ;;  %v2362_v55 = vld [vmem:[#allocation4 + $0x248] sm:$0xf]  ;;  %v2786_v38 = vld [vmem:[#allocation6 + $0x2a0] sm:$0xf]  ;;  %v3021_v39 = vld [vmem:[#allocation6 + $0x2a8] sm:$0xf0] }
 0x117   :  { %v222_v16 = vadd.f32 %v221_v10, %v125_v53  ;;  %v236_v17 = vadd.f32 %v235_v11, %v126_v59  ;;  %1078 = vmatpush.bf16.msra.mxu0 %v2159_v0  ;;  %1092 = vmatpush.bf16.msra.mxu1 %v2255_v1  ;;  %v2902_v53 = vld [vmem:[#allocation4 + $0x1f0] sm:$0xf0]  ;;  %v2410_v59 = vld [vmem:[#allocation4 + $0x2a8] sm:$0xf]  ;;  %v2848_v0 = vld [vmem:[#allocation4 + $0x40] sm:$0xf0]  ;;  %v261_v20 = vpop.f32.mrf.mxu1 }
 0x118   :  { %v2194_v1 = vld [vmem:[#allocation4 + $0xf8] sm:$0xf]  ;;  %v2315_v3 = vor.u32 %v2902_v53, %v2314_v58  ;;  %v2411_v6 = vor.u32 %v2926_v60, %v2410_v59  ;;  %v2923_v10 = vld [vmem:[#allocation4 + $0x298] sm:$0xf0]  ;;  %v2099_v11 = vor.u32 %v2848_v0, %v2098_v63  ;;  %v3006_v58 = vld [vmem:[#allocation6 + $0x230] sm:$0xf0]  ;;  %v2267_v63 = vor.u32 %v2890_v54, %v2266_v52 }
 0x119   :  { %v304_v26 = vmax.f32 %v222_v16, 0.0  ;;  %v305_v27 = vmax.f32 %v236_v17, 0.0  ;;  %v2869_v16 = vld [vmem:[#allocation4 + $0xe8] sm:$0xf0]  ;;  %v2303_v17 = vor.u32 %v2899_v8, %v2302_v7  ;;  %v2822_v53 = vld [vmem:[#allocation6 + $0x2e8] sm:$0xf] }
 0x11a   :  { %v3030_v59 = vld [vmem:[#allocation6 + $0x2f0] sm:$0xf0]  ;;  %v2714_v8 = vld [vmem:[#allocation6 + $0x210] sm:$0xf]  ;;  %v2774_v54 = vld [vmem:[#allocation6 + $0x288] sm:$0xf] }
 0x11b   :  { %v3240_v33 = vpack.c.bf16 %v304_v26, %v296_v24  ;;  %v3242_v34 = vpack.c.bf16 %v305_v27, %v297_v25  ;;  %1079 = vmatpush.bf16.msra.mxu0 %v2147_v12  ;;  %1093 = vmatpush.bf16.msra.mxu1 %v2243_v18  ;;  %v2195_v12 = vor.u32 %v2872_v2, %v2194_v1  ;;  %v2074_v25 = vld [vmem:[#allocation4 + $0x8] sm:$0xf]  ;;  %v2842_v26 = vld [vmem:[#allocation4 + $0x10] sm:$0xf0]  ;;  %v2952_v1 = vld [vmem:[#allocation6 + $0x80] sm:$0xf0] }
 0x11c   :  { %v2399_v18 = vor.u32 %v2923_v10, %v2398_v9  ;;  %v2183_v24 = vor.u32 %v2869_v16, %v2182_v15  ;;  %v2170_v27 = vld [vmem:[#allocation4 + $0xc8] sm:$0xf]  ;;  %v2075_v42 = vor.u32 %v2842_v26, %v2074_v25  ;;  %v2606_v2 = vld [vmem:[#allocation6 + $0x138] sm:$0xf]  ;;  %v2823_v7 = vor.u32 %v3030_v59, %v2822_v53  ;;  %v3003_v9 = vld [vmem:[#allocation6 + $0x218] sm:$0xf0] }
 0x11d   :  { %1002 = vmatmul.bf16.vlgmr.msra.gmra.mxu2 %v3240_v33  ;;  %1016 = vmatmul.bf16.vlgmr.msra.gmra.mxu3 %v3242_v34  ;;  %v2810_v10 = vld [vmem:[#allocation6 + $0x2d0] sm:$0xf]  ;;  %v2949_v15 = vld [vmem:[#allocation6 + $0x68] sm:$0xf0]  ;;  %v2594_v16 = vld [vmem:[#allocation6 + $0x120] sm:$0xf] }
 0x11e   :  { %1106 = vmatpush.bf16.msra.mxu2 %v2351_v28  ;;  %1120 = vmatpush.bf16.msra.mxu3 %v2447_v29  ;;  %v2866_v28 = vld [vmem:[#allocation4 + $0xd0] sm:$0xf0]  ;;  %v2534_v29 = vld [vmem:[#allocation6 + $0xa8] sm:$0xf]  ;;  %v2499_v25 = vor.u32 %v2949_v15, %v2498_v14  ;;  %v3256_v40 = vpop.f32.mrf.mxu2  ;;  %v2450_v15 = vld [vmem:[#allocation6] sm:$0xf] }
 0x11f   :  { %1080 = vmatpush.bf16.msra.mxu0 %v2135_v30  ;;  %1094 = vmatpush.bf16.msra.mxu1 %v2231_v35  ;;  %v2958_v30 = vld [vmem:[#allocation6 + $0xb0] sm:$0xf0]  ;;  %v2630_v35 = vld [vmem:[#allocation6 + $0x168] sm:$0xf] }
 0x120   :  { %v2631_v45 = vor.u32 %v2982_v36, %v2630_v35  ;;  %v2690_v36 = vld [vmem:[#allocation6 + $0x1e0] sm:$0xf]  ;;  %v2994_v52 = vld [vmem:[#allocation6 + $0x1d0] sm:$0xf0] }
 0x122   :  { %1107 = vmatpush.bf16.msra.mxu2 %v2339_v43  ;;  %1121 = vmatpush.bf16.msra.mxu3 %v2435_v44  ;;  %v2171_v43 = vor.u32 %v2866_v28, %v2170_v27  ;;  %v2535_v44 = vor.u32 %v2958_v30, %v2534_v29  ;;  %v2486_v27 = vld [vmem:[#allocation6 + $0x48] sm:$0xf]  ;;  %v2946_v28 = vld [vmem:[#allocation6 + $0x50] sm:$0xf0] }
 0x123   :  { %1081 = vmatpush.bf16.msra.mxu0 %v2123_v46  ;;  %1095 = vmatpush.bf16.msra.mxu1 %v2219_v47  ;;  %v2522_v46 = vld [vmem:[#allocation6 + $0x90] sm:$0xf]  ;;  %v2955_v47 = vld [vmem:[#allocation6 + $0x98] sm:$0xf0]  ;;  %v2582_v29 = vld [vmem:[#allocation6 + $0x108] sm:$0xf] }
 0x124   :  { %v2523_v60 = vor.u32 %v2955_v47, %v2522_v46  ;;  %v2970_v30 = vld [vmem:[#allocation6 + $0x110] sm:$0xf0]  ;;  %v2570_v46 = vld [vmem:[#allocation6 + $0xf0] sm:$0xf]  ;;  %v2967_v47 = vld [vmem:[#allocation6 + $0xf8] sm:$0xf0] }
 0x125   :  { %v2571_v59 = vor.u32 %v2967_v47, %v2570_v46  ;;  %v2620_v46 = vld [vmem:[#allocation6 + $0x15c] sm:$0xf0] }
 0x126   :  { %1108 = vmatpush.bf16.msra.mxu2 %v2327_v56  ;;  %1122 = vmatpush.bf16.msra.mxu3 %v2423_v57  ;;  %v2914_v56 = vld [vmem:[#allocation4 + $0x250] sm:$0xf0]  ;;  %v2726_v57 = vld [vmem:[#allocation6 + $0x228] sm:$0xf]  ;;  %v2642_v47 = vld [vmem:[#allocation6 + $0x180] sm:$0xf] }
 0x127   :  { %1030 = vmatmul.bf16.vlgmr.msrb.gmra.mxu0 %v3234_v4  ;;  %1044 = vmatmul.bf16.vlgmr.msrb.gmra.mxu1 %v3236_v5  ;;  %v2363_v0 = vor.u32 %v2914_v56, %v2362_v55  ;;  %v3018_v55 = vld [vmem:[#allocation6 + $0x290] sm:$0xf0]  ;;  %v129_v56 = vperm.slane %v3228_v41, 6 }
 0x128   :  { %1082 = vmatpush.bf16.msra.mxu0 %v2111_v61  ;;  %1096 = vmatpush.bf16.msra.mxu1 %v2207_v62  ;;  %v2619_v61 = vor.u32 %v2979_v51, %v2618_v48  ;;  %v2510_v62 = vld [vmem:[#allocation6 + $0x78] sm:$0xf]  ;;  %v2678_v51 = vld [vmem:[#allocation6 + $0x1c8] sm:$0xf] }
 0x12a   :  { %1109 = vmatpush.bf16.msra.mxu2 %v2315_v3  ;;  %1123 = vmatpush.bf16.msra.mxu3 %v2411_v6  ;;  %v2976_v3 = vld [vmem:[#allocation6 + $0x140] sm:$0xf0]  ;;  %v2727_v6 = vor.u32 %v3006_v58, %v2726_v57  ;;  %v130_v57 = vperm.slane %v3228_v41, 7 }
 0x12b   :  { %v2607_v13 = vor.u32 %v2976_v3, %v2606_v2  ;;  %v2679_v3 = vor.u32 %v2994_v52, %v2678_v51  ;;  %v3009_v51 = vld [vmem:[#allocation6 + $0x248] sm:$0xf0] }
 0x12c   :  { %1083 = vmatpush.bf16.msra.mxu0 %v2099_v11  ;;  %1097 = vmatpush.bf16.msra.mxu1 %v2195_v12  ;;  %v3027_v11 = vld [vmem:[#allocation6 + $0x2d8] sm:$0xf0]  ;;  %v2511_v12 = vor.u32 %v2952_v1, %v2510_v62  ;;  %v2940_v62 = vld [vmem:[#allocation6 + $0x20] sm:$0xf0]  ;;  %v3005_v52 = vld [vmem:[#allocation6 + $0x22c] sm:$0xf] }
 0x12d   :  { %1058 = vmatmul.bf16.vlgmr.msrb.gmra.mxu2 %v3240_v33  ;;  %1072 = vmatmul.bf16.vlgmr.msrb.gmra.mxu3 %v3242_v34 }
 0x12e   :  { %1110 = vmatpush.bf16.msra.mxu2 %v2303_v17  ;;  %1124 = vmatpush.bf16.msra.mxu3 %v2399_v18  ;;  %v2973_v17 = vld [vmem:[#allocation6 + $0x128] sm:$0xf0]  ;;  %v247_v18 = vpop.f32.mrf.mxu0 }
 0x12f   :  { %v2595_v26 = vor.u32 %v2973_v17, %v2594_v16  ;;  %v2937_v16 = vld [vmem:[#allocation6 + $0x8] sm:$0xf0]  ;;  %v2546_v17 = vld [vmem:[#allocation6 + $0xc0] sm:$0xf] }
 0x130   :  { %1084 = vmatpush.bf16.msra.mxu0 %v2087_v23  ;;  %1098 = vmatpush.bf16.msra.mxu1 %v2183_v24  ;;  %v3024_v23 = vld [vmem:[#allocation6 + $0x2c0] sm:$0xf0]  ;;  %v127_v24 = vperm.slane %v3228_v41, 4 }
 0x131   :  { %v2799_v35 = vor.u32 %v3024_v23, %v2798_v22  ;;  %v2981_v22 = vld [vmem:[#allocation6 + $0x16c] sm:$0xf]  ;;  %v2632_v23 = vld [vmem:[#allocation6 + $0x174] sm:$0xf0] }
 0x132   :  { %1111 = vmatpush.bf16.msra.mxu2 %v2291_v31  ;;  %1125 = vmatpush.bf16.msra.mxu3 %v2387_v32  ;;  %v128_v31 = vperm.slane %v3228_v41, 5  ;;  %v2703_v32 = vor.u32 %v3000_v21, %v2702_v19  ;;  %v277_v19 = vpop.f32.mrf.mxu2 }
 0x134   :  { %1085 = vmatpush.bf16.msra.mxu0 %v2075_v42  ;;  %1099 = vmatpush.bf16.msra.mxu1 %v2171_v43  ;;  %v2583_v42 = vor.u32 %v2970_v30, %v2582_v29  ;;  %v3258_v43 = vadd.f32 %v247_v18, %v127_v24  ;;  %v3262_v48 = vadd.f32 %v261_v20, %v128_v31  ;;  %v2961_v18 = vld [vmem:[#allocation6 + $0xc8] sm:$0xf0] }
 0x136   :  { %1112 = vmatpush.bf16.msra.mxu2 %v2279_v49  ;;  %1126 = vmatpush.bf16.msra.mxu3 %v2375_v50  ;;  %v2691_v49 = vor.u32 %v2997_v37, %v2690_v36  ;;  %v2787_v50 = vor.u32 %v3021_v39, %v2786_v38  ;;  %v249_v58 = vpop.f32.mrf.mxu0  ;;  %v298_v1 = vmax.f32 %v3258_v43, 0.0  ;;  %v299_v2 = vmax.f32 %v3262_v48, 0.0  ;;  %v2954_v39 = vld [vmem:[#allocation6 + $0x94] sm:$0xf] }
 0x137   :  { %1086 = vmatmul.bf16.vlgmr.msra.gmra.mxu0 %v3234_v4  ;;  %1100 = vmatmul.bf16.vlgmr.msra.gmra.mxu1 %v3236_v5  ;;  %v2715_v4 = vor.u32 %v3003_v9, %v2714_v8  ;;  %v2811_v5 = vor.u32 %v3027_v11, %v2810_v10  ;;  %v250_v8 = vadd.f32 %v249_v58, %v127_v24  ;;  %v2991_v9 = vld [vmem:[#allocation6 + $0x1b8] sm:$0xf0]  ;;  %v2762_v10 = vld [vmem:[#allocation6 + $0x270] sm:$0xf]  ;;  %v2654_v24 = vld [vmem:[#allocation6 + $0x198] sm:$0xf] }
 0x138   :  { %1788 = vmatpush.bf16.msrb.mxu0 %v2535_v44  ;;  %1802 = vmatpush.bf16.msrb.mxu1 %v2631_v45  ;;  %v3260_v44 = vpop.f32.mrf.mxu3  ;;  %v2943_v45 = vld [vmem:[#allocation6 + $0x38] sm:$0xf0]  ;;  %v278_v36 = vadd.f32 %v277_v19, %v129_v56  ;;  %v2635_v38 = vor.u32 %v2981_v22, %v2632_v23  ;;  %v2824_v58 = vld [vmem:[#allocation6 + $0x2f4] sm:$0xf0]  ;;  %v2800_v22 = vld [vmem:[#allocation6 + $0x2c4] sm:$0xf0] }
 0x139   :  { %v3015_v11 = vld [vmem:[#allocation6 + $0x278] sm:$0xf0]  ;;  %v306_v29 = vmax.f32 %v250_v8, 0.0  ;;  %v3026_v8 = vld [vmem:[#allocation6 + $0x2d4] sm:$0xf] }
 0x13a   :  { %1113 = vmatpush.bf16.msra.mxu2 %v2267_v63  ;;  %1127 = vmatpush.bf16.msra.mxu3 %v2363_v0  ;;  %v2558_v63 = vld [vmem:[#allocation6 + $0xd8] sm:$0xf]  ;;  %v2964_v0 = vld [vmem:[#allocation6 + $0xe0] sm:$0xf0]  ;;  %v2763_v21 = vor.u32 %v3015_v11, %v2762_v10  ;;  %v2999_v19 = vld [vmem:[#allocation6 + $0x1fc] sm:$0xf] }
 0x13b   :  { %v2559_v14 = vor.u32 %v2964_v0, %v2558_v63  ;;  %v2951_v63 = vld [vmem:[#allocation6 + $0x7c] sm:$0xf]  ;;  %v2512_v0 = vld [vmem:[#allocation6 + $0x84] sm:$0xf0] }
 0x13c   :  { %1789 = vmatpush.bf16.msrb.mxu0 %v2523_v60  ;;  %1803 = vmatpush.bf16.msrb.mxu1 %v2619_v61  ;;  %v2462_v60 = vld [vmem:[#allocation6 + $0x18] sm:$0xf]  ;;  %v263_v61 = vpop.f32.mrf.mxu1 }
 0x13d   :  { %1114 = vmatmul.bf16.vlgmr.msra.gmra.mxu2 %v3240_v33  ;;  %1128 = vmatmul.bf16.vlgmr.msra.gmra.mxu3 %v3242_v34  ;;  %v2487_v33 = vor.u32 %v2946_v28, %v2486_v27  ;;  %v2474_v34 = vld [vmem:[#allocation6 + $0x30] sm:$0xf]  ;;  %v2750_v27 = vld [vmem:[#allocation6 + $0x258] sm:$0xf]  ;;  %v3012_v28 = vld [vmem:[#allocation6 + $0x260] sm:$0xf0] }
 0x13e   :  { %1816 = vmatpush.bf16.msrb.mxu2 %v2727_v6  ;;  %1830 = vmatpush.bf16.msrb.mxu3 %v2823_v7  ;;  %v2475_v53 = vor.u32 %v2943_v45, %v2474_v34  ;;  %v2775_v6 = vor.u32 %v3018_v55, %v2774_v54  ;;  %v2666_v7 = vld [vmem:[#allocation6 + $0x1b0] sm:$0xf]  ;;  %v2751_v45 = vor.u32 %v3012_v28, %v2750_v27  ;;  %v2728_v55 = vld [vmem:[#allocation6 + $0x234] sm:$0xf0] }
 0x13f   :  { %v2667_v20 = vor.u32 %v2991_v9, %v2666_v7  ;;  %v3274_v54 = vpack.c.bf16 %v306_v29, %v298_v1  ;;  %v2731_v1 = vor.u32 %v3005_v52, %v2728_v55  ;;  %v2716_v7 = vld [vmem:[#allocation6 + $0x21c] sm:$0xf0]  ;;  %v2969_v29 = vld [vmem:[#allocation6 + $0x10c] sm:$0xf]  ;;  %v2464_v55 = vld [vmem:[#allocation6 + $0x24] sm:$0xf0] }
 0x140   :  { %1790 = vmatpush.bf16.msrb.mxu0 %v2511_v12  ;;  %1804 = vmatpush.bf16.msrb.mxu1 %v2607_v13  ;;  %v264_v12 = vadd.f32 %v263_v61, %v128_v31  ;;  %v2463_v13 = vor.u32 %v2940_v62, %v2462_v60  ;;  %v2451_v31 = vor.u32 %v2937_v16, %v2450_v15  ;;  %v308_v62 = vmax.f32 %v278_v36, 0.0  ;;  %v2812_v9 = vld [vmem:[#allocation6 + $0x2dc] sm:$0xf0]  ;;  %v2500_v15 = vld [vmem:[#allocation6 + $0x6c] sm:$0xf0] }
 0x141   :  { %v2788_v36 = vld [vmem:[#allocation6 + $0x2ac] sm:$0xf0] }
 0x142   :  { %1817 = vmatpush.bf16.msrb.mxu2 %v2715_v4  ;;  %1831 = vmatpush.bf16.msrb.mxu3 %v2811_v5  ;;  %v2957_v4 = vld [vmem:[#allocation6 + $0xac] sm:$0xf]  ;;  %v2536_v5 = vld [vmem:[#allocation6 + $0xb4] sm:$0xf0]  ;;  %v307_v30 = vmax.f32 %v264_v12, 0.0  ;;  %v2515_v12 = vor.u32 %v2951_v63, %v2512_v0 }
 0x143   :  { %v2539_v37 = vor.u32 %v2957_v4, %v2536_v5  ;;  %v2972_v4 = vld [vmem:[#allocation6 + $0x124] sm:$0xf]  ;;  %v2596_v5 = vld [vmem:[#allocation6 + $0x12c] sm:$0xf0] }
 0x144   :  { %1791 = vmatpush.bf16.msrb.mxu0 %v2499_v25  ;;  %1805 = vmatpush.bf16.msrb.mxu1 %v2595_v26  ;;  %v291_v25 = vpop.f32.mrf.mxu3  ;;  %v2988_v26 = vld [vmem:[#allocation6 + $0x1a0] sm:$0xf0] }
 0x145   :  { %v292_v34 = vadd.f32 %v291_v25, %v130_v57  ;;  %v2655_v43 = vor.u32 %v2988_v26, %v2654_v24  ;;  %v2599_v24 = vor.u32 %v2972_v4, %v2596_v5  ;;  %v2945_v25 = vld [vmem:[#allocation6 + $0x4c] sm:$0xf]  ;;  %v2488_v26 = vld [vmem:[#allocation6 + $0x54] sm:$0xf0]  ;;  %v2936_v0 = vld [vmem:[#allocation6 + $0x4] sm:$0xf] }
 0x146   :  { %1818 = vmatpush.bf16.msrb.mxu2 %v2703_v32  ;;  %1832 = vmatpush.bf16.msrb.mxu3 %v2799_v35  ;;  %v2547_v32 = vor.u32 %v2961_v18, %v2546_v17  ;;  %v276_v35 = vadd.f32 %v3256_v40, %v129_v56  ;;  %v290_v40 = vadd.f32 %v3260_v44, %v130_v57  ;;  %v3029_v56 = vld [vmem:[#allocation6 + $0x2ec] sm:$0xf] }
 0x147   :  { %v309_v41 = vmax.f32 %v292_v34, 0.0  ;;  %v2827_v48 = vor.u32 %v3029_v56, %v2824_v58  ;;  %v2815_v18 = vor.u32 %v3026_v8, %v2812_v9  ;;  %v2959_v8 = vld [vmem:[#allocation6 + $0xb8] sm:$0xf0]  ;;  %v2638_v9 = vld [vmem:[#allocation6 + $0x170] sm:$0xf] }
 0x148   :  { %1792 = vmatpush.bf16.msrb.mxu0 %v2487_v33  ;;  %1806 = vmatpush.bf16.msrb.mxu1 %v2583_v42  ;;  %v2524_v33 = vld [vmem:[#allocation6 + $0x9c] sm:$0xf0]  ;;  %v2978_v42 = vld [vmem:[#allocation6 + $0x154] sm:$0xf]  ;;  %v301_v10 = vmax.f32 %v290_v40, 0.0 }
 0x149   :  { %v2527_v60 = vor.u32 %v2954_v39, %v2524_v33  ;;  %v2623_v61 = vor.u32 %v2978_v42, %v2620_v46  ;;  %v2942_v39 = vld [vmem:[#allocation6 + $0x34] sm:$0xf]  ;;  %v2476_v33 = vld [vmem:[#allocation6 + $0x3c] sm:$0xf0]  ;;  %v2993_v46 = vld [vmem:[#allocation6 + $0x1cc] sm:$0xf] }
 0x14a   :  { %1819 = vmatpush.bf16.msrb.mxu2 %v2691_v49  ;;  %1833 = vmatpush.bf16.msrb.mxu3 %v2787_v50  ;;  %v2985_v49 = vld [vmem:[#allocation6 + $0x188] sm:$0xf0]  ;;  %v2738_v50 = vld [vmem:[#allocation6 + $0x240] sm:$0xf]  ;;  %v3284_v16 = vpack.c.bf16 %v309_v41, %v301_v10  ;;  %v2939_v40 = vld [vmem:[#allocation6 + $0x1c] sm:$0xf] }
 0x14b   :  { %v2643_v44 = vor.u32 %v2985_v49, %v2642_v47  ;;  %v2739_v57 = vor.u32 %v3009_v51, %v2738_v50  ;;  %v2680_v47 = vld [vmem:[#allocation6 + $0x1d4] sm:$0xf0]  ;;  %v3017_v49 = vld [vmem:[#allocation6 + $0x28c] sm:$0xf]  ;;  %v2479_v51 = vor.u32 %v2942_v39, %v2476_v33  ;;  %v3014_v41 = vld [vmem:[#allocation6 + $0x274] sm:$0xf] }
 0x14c   :  { %1793 = vmatpush.bf16.msrb.mxu0 %v2475_v53  ;;  %1807 = vmatpush.bf16.msrb.mxu1 %v2571_v59  ;;  %v300_v53 = vmax.f32 %v276_v35, 0.0  ;;  %v3278_v59 = vpack.c.bf16 %v307_v30, %v299_v2  ;;  %v2975_v2 = vld [vmem:[#allocation6 + $0x13c] sm:$0xf]  ;;  %v2584_v30 = vld [vmem:[#allocation6 + $0x114] sm:$0xf0]  ;;  %v2683_v56 = vor.u32 %v2993_v46, %v2680_v47 }
 0x14d   :  { %v3020_v35 = vld [vmem:[#allocation6 + $0x2a4] sm:$0xf]  ;;  %v2776_v50 = vld [vmem:[#allocation6 + $0x294] sm:$0xf0]  ;;  %v2983_v10 = vld [vmem:[#allocation6 + $0x178] sm:$0xf0] }
 0x14e   :  { %1820 = vmatpush.bf16.msrb.mxu2 %v2679_v3  ;;  %1834 = vmatpush.bf16.msrb.mxu3 %v2775_v6  ;;  %v2608_v3 = vld [vmem:[#allocation6 + $0x144] sm:$0xf0]  ;;  %v3002_v6 = vld [vmem:[#allocation6 + $0x214] sm:$0xf]  ;;  %v3282_v11 = vpack.c.bf16 %v308_v62, %v300_v53  ;;  %v2791_v34 = vor.u32 %v3020_v35, %v2788_v36  ;;  %v2779_v58 = vor.u32 %v3017_v49, %v2776_v50  ;;  %v2963_v53 = vld [vmem:[#allocation6 + $0xdc] sm:$0xf] }
 0x14f   :  { %v2719_v17 = vor.u32 %v3002_v6, %v2716_v7  ;;  %v2668_v62 = vld [vmem:[#allocation6 + $0x1bc] sm:$0xf0]  ;;  %v2548_v6 = vld [vmem:[#allocation6 + $0xcc] sm:$0xf0]  ;;  %v2639_v5 = vor.u32 %v2983_v10, %v2638_v9  ;;  %v2953_v33 = vld [vmem:[#allocation6 + $0x88] sm:$0xf0] }
 0x150   :  { %1794 = vmatpush.bf16.msrb.mxu0 %v2463_v13  ;;  %1808 = vmatpush.bf16.msrb.mxu1 %v2559_v14  ;;  %v2611_v13 = vor.u32 %v2975_v2, %v2608_v3  ;;  %v2948_v14 = vld [vmem:[#allocation6 + $0x64] sm:$0xf]  ;;  %v2542_v7 = vld [vmem:[#allocation6 + $0xb0] sm:$0xf]  ;;  %v2518_v39 = vld [vmem:[#allocation6 + $0x80] sm:$0xf] }
 0x151   :  { %v2503_v23 = vor.u32 %v2948_v14, %v2500_v15  ;;  %v3011_v14 = vld [vmem:[#allocation6 + $0x25c] sm:$0xf]  ;;  %v2752_v15 = vld [vmem:[#allocation6 + $0x264] sm:$0xf0]  ;;  %v2543_v4 = vor.u32 %v2959_v8, %v2542_v7  ;;  %v2722_v46 = vld [vmem:[#allocation6 + $0x218] sm:$0xf] }
 0x152   :  { %1821 = vmatpush.bf16.msrb.mxu2 %v2667_v20  ;;  %1835 = vmatpush.bf16.msrb.mxu3 %v2763_v21  ;;  %v2704_v20 = vld [vmem:[#allocation6 + $0x204] sm:$0xf0]  ;;  %v3023_v21 = vld [vmem:[#allocation6 + $0x2bc] sm:$0xf]  ;;  %v3004_v47 = vld [vmem:[#allocation6 + $0x220] sm:$0xf0] }
 0x153   :  { %v2707_v27 = vor.u32 %v2999_v19, %v2704_v20  ;;  %v2803_v28 = vor.u32 %v3023_v21, %v2800_v22  ;;  %v2530_v19 = vld [vmem:[#allocation6 + $0x98] sm:$0xf]  ;;  %v2956_v20 = vld [vmem:[#allocation6 + $0xa0] sm:$0xf0]  ;;  %v2698_v7 = vld [vmem:[#allocation6 + $0x1e8] sm:$0xf] }
 0x154   :  { %1795 = vmatpush.bf16.msrb.mxu0 %v2451_v31  ;;  %1809 = vmatpush.bf16.msrb.mxu1 %v2547_v32  ;;  %v2996_v31 = vld [vmem:[#allocation6 + $0x1e4] sm:$0xf]  ;;  %v2692_v32 = vld [vmem:[#allocation6 + $0x1ec] sm:$0xf0]  ;;  %v2626_v21 = vld [vmem:[#allocation6 + $0x158] sm:$0xf]  ;;  %v2531_v35 = vor.u32 %v2956_v20, %v2530_v19 }
 0x155   :  { %v2695_v42 = vor.u32 %v2996_v31, %v2692_v32  ;;  %v2830_v31 = vld [vmem:[#allocation6 + $0x2f0] sm:$0xf]  ;;  %v3031_v32 = vld [vmem:[#allocation6 + $0x2f8] sm:$0xf0]  ;;  %v2818_v49 = vld [vmem:[#allocation6 + $0x2d8] sm:$0xf] }
 0x156   :  { %1822 = vmatpush.bf16.msrb.mxu2 %v2655_v43  ;;  %1836 = vmatpush.bf16.msrb.mxu3 %v2751_v45  ;;  %v2966_v43 = vld [vmem:[#allocation6 + $0xf4] sm:$0xf]  ;;  %v2572_v45 = vld [vmem:[#allocation6 + $0xfc] sm:$0xf0]  ;;  %v3028_v50 = vld [vmem:[#allocation6 + $0x2e0] sm:$0xf0] }
 0x157   :  { %1796 = vmatmul.bf16.vlgmr.msrb.gmra.mxu0 %v3274_v54  ;;  %1810 = vmatmul.bf16.vlgmr.msrb.gmra.mxu1 %v3278_v59  ;;  %v2575_v52 = vor.u32 %v2966_v43, %v2572_v45  ;;  %v2614_v43 = vld [vmem:[#allocation6 + $0x140] sm:$0xf]  ;;  %v2977_v45 = vld [vmem:[#allocation6 + $0x148] sm:$0xf0]  ;;  %v2998_v8 = vld [vmem:[#allocation6 + $0x1f0] sm:$0xf0] }
 0x158   :  { %1844 = vmatpush.bf16.msra.mxu0 %v2539_v37  ;;  %1858 = vmatpush.bf16.msra.mxu1 %v2635_v38  ;;  %v2491_v37 = vor.u32 %v2945_v25, %v2488_v26  ;;  %v2587_v38 = vor.u32 %v2969_v29, %v2584_v30  ;;  %v2984_v25 = vld [vmem:[#allocation6 + $0x184] sm:$0xf]  ;;  %v2644_v26 = vld [vmem:[#allocation6 + $0x18c] sm:$0xf0]  ;;  %v3007_v30 = vld [vmem:[#allocation6 + $0x238] sm:$0xf0] }
 0x159   :  { %v2734_v29 = vld [vmem:[#allocation6 + $0x230] sm:$0xf]  ;;  %v2794_v9 = vld [vmem:[#allocation6 + $0x2a8] sm:$0xf]  ;;  %v3022_v10 = vld [vmem:[#allocation6 + $0x2b0] sm:$0xf0] }
 0x15a   :  { %1823 = vmatpush.bf16.msrb.mxu2 %v2643_v44  ;;  %1837 = vmatpush.bf16.msrb.mxu3 %v2739_v57  ;;  %v2764_v44 = vld [vmem:[#allocation6 + $0x27c] sm:$0xf0]  ;;  %v2467_v57 = vor.u32 %v2939_v40, %v2464_v55  ;;  %v2506_v40 = vld [vmem:[#allocation6 + $0x68] sm:$0xf]  ;;  %v2950_v55 = vld [vmem:[#allocation6 + $0x70] sm:$0xf0] }
 0x15b   :  { %v2767_v3 = vor.u32 %v3014_v41, %v2764_v44  ;;  %v2806_v41 = vld [vmem:[#allocation6 + $0x2c0] sm:$0xf]  ;;  %v3025_v44 = vld [vmem:[#allocation6 + $0x2c8] sm:$0xf0]  ;;  %v2686_v19 = vld [vmem:[#allocation6 + $0x1d0] sm:$0xf] }
 0x15c   :  { %1845 = vmatpush.bf16.msra.mxu0 %v2527_v60  ;;  %1859 = vmatpush.bf16.msra.mxu1 %v2623_v61  ;;  %v2560_v60 = vld [vmem:[#allocation6 + $0xe4] sm:$0xf0]  ;;  %v2990_v61 = vld [vmem:[#allocation6 + $0x1b4] sm:$0xf]  ;;  %v2995_v20 = vld [vmem:[#allocation6 + $0x1d8] sm:$0xf0] }
 0x15d   :  { %1824 = vmatmul.bf16.vlgmr.msrb.gmra.mxu2 %v3282_v11  ;;  %1838 = vmatmul.bf16.vlgmr.msrb.gmra.mxu3 %v3284_v16  ;;  %v2563_v63 = vor.u32 %v2963_v53, %v2560_v60  ;;  %v2671_v2 = vor.u32 %v2990_v61, %v2668_v62  ;;  %v2602_v53 = vld [vmem:[#allocation6 + $0x128] sm:$0xf]  ;;  %v2974_v60 = vld [vmem:[#allocation6 + $0x130] sm:$0xf0]  ;;  %v2710_v61 = vld [vmem:[#allocation6 + $0x200] sm:$0xf] }
 0x15e   :  { %1872 = vmatpush.bf16.msra.mxu2 %v2731_v1  ;;  %1886 = vmatpush.bf16.msra.mxu3 %v2827_v48  ;;  %v2452_v1 = vld [vmem:[#allocation6 + $0xc] sm:$0xf0]  ;;  %v2960_v48 = vld [vmem:[#allocation6 + $0xc4] sm:$0xf]  ;;  %v3001_v62 = vld [vmem:[#allocation6 + $0x208] sm:$0xf0] }
 0x160   :  { %1846 = vmatpush.bf16.msra.mxu0 %v2515_v12  ;;  %1860 = vmatpush.bf16.msra.mxu1 %v2611_v13  ;;  %v2987_v12 = vld [vmem:[#allocation6 + $0x19c] sm:$0xf]  ;;  %v2656_v13 = vld [vmem:[#allocation6 + $0x1a4] sm:$0xf0] }
 0x161   :  { %v2659_v22 = vor.u32 %v2987_v12, %v2656_v13 }
 0x162   :  { %1873 = vmatpush.bf16.msra.mxu2 %v2719_v17  ;;  %1887 = vmatpush.bf16.msra.mxu3 %v2815_v18  ;;  %v2455_v17 = vor.u32 %v2936_v0, %v2452_v1  ;;  %v2551_v18 = vor.u32 %v2960_v48, %v2548_v6  ;;  %v2494_v0 = vld [vmem:[#allocation6 + $0x50] sm:$0xf]  ;;  %v2947_v1 = vld [vmem:[#allocation6 + $0x58] sm:$0xf0]  ;;  %v2711_v48 = vor.u32 %v3001_v62, %v2710_v61 }
 0x163   :  { %v2971_v6 = vld [vmem:[#allocation6 + $0x118] sm:$0xf0]  ;;  %v2495_v12 = vor.u32 %v2947_v1, %v2494_v0 }
 0x164   :  { %1847 = vmatpush.bf16.msra.mxu0 %v2503_v23  ;;  %1861 = vmatpush.bf16.msra.mxu1 %v2599_v24  ;;  %v2755_v23 = vor.u32 %v3011_v14, %v2752_v15  ;;  %v2980_v24 = vld [vmem:[#allocation6 + $0x160] sm:$0xf0]  ;;  %v2482_v14 = vld [vmem:[#allocation6 + $0x38] sm:$0xf] }
 0x165   :  { %v2627_v36 = vor.u32 %v2980_v24, %v2626_v21  ;;  %v2944_v15 = vld [vmem:[#allocation6 + $0x40] sm:$0xf0]  ;;  %v2782_v21 = vld [vmem:[#allocation6 + $0x290] sm:$0xf] }
 0x166   :  { %1874 = vmatpush.bf16.msra.mxu2 %v2707_v27  ;;  %1888 = vmatpush.bf16.msra.mxu3 %v2803_v28  ;;  %v3008_v27 = vld [vmem:[#allocation6 + $0x244] sm:$0xf]  ;;  %v2740_v28 = vld [vmem:[#allocation6 + $0x24c] sm:$0xf0] }
 0x168   :  { %1848 = vmatpush.bf16.msra.mxu0 %v2491_v37  ;;  %1862 = vmatpush.bf16.msra.mxu1 %v2587_v38  ;;  %v2647_v37 = vor.u32 %v2984_v25, %v2644_v26  ;;  %v2743_v38 = vor.u32 %v3008_v27, %v2740_v28  ;;  %v2470_v25 = vld [vmem:[#allocation6 + $0x20] sm:$0xf]  ;;  %v2941_v26 = vld [vmem:[#allocation6 + $0x28] sm:$0xf0]  ;;  %v2687_v27 = vor.u32 %v2995_v20, %v2686_v19 }
 0x16a   :  { %1875 = vmatpush.bf16.msra.mxu2 %v2695_v42  ;;  %1889 = vmatpush.bf16.msra.mxu3 %v2791_v34  ;;  %v2735_v42 = vor.u32 %v3007_v30, %v2734_v29  ;;  %v2831_v34 = vor.u32 %v3031_v32, %v2830_v31  ;;  %v2566_v29 = vld [vmem:[#allocation6 + $0xe0] sm:$0xf]  ;;  %v2965_v30 = vld [vmem:[#allocation6 + $0xe8] sm:$0xf0]  ;;  %v2674_v31 = vld [vmem:[#allocation6 + $0x1b8] sm:$0xf] }
 0x16b   :  { %v2992_v32 = vld [vmem:[#allocation6 + $0x1c0] sm:$0xf0] }
 0x16c   :  { %1849 = vmatpush.bf16.msra.mxu0 %v2479_v51  ;;  %1863 = vmatpush.bf16.msra.mxu1 %v2575_v52  ;;  %v2519_v51 = vor.u32 %v2953_v33, %v2518_v39  ;;  %v2615_v52 = vor.u32 %v2977_v45, %v2614_v43  ;;  %v2458_v39 = vld [vmem:[#allocation6 + $0x8] sm:$0xf]  ;;  %v2938_v33 = vld [vmem:[#allocation6 + $0x10] sm:$0xf0] }
 0x16d   :  { %v2554_v43 = vld [vmem:[#allocation6 + $0xc8] sm:$0xf]  ;;  %v2962_v45 = vld [vmem:[#allocation6 + $0xd0] sm:$0xf0] }
 0x16e   :  { %1876 = vmatpush.bf16.msra.mxu2 %v2683_v56  ;;  %1890 = vmatpush.bf16.msra.mxu3 %v2779_v58  ;;  %v2723_v56 = vor.u32 %v3004_v47, %v2722_v46  ;;  %v2819_v58 = vor.u32 %v3028_v50, %v2818_v49  ;;  %v2662_v46 = vld [vmem:[#allocation6 + $0x1a0] sm:$0xf]  ;;  %v2989_v47 = vld [vmem:[#allocation6 + $0x1a8] sm:$0xf0] }
 0x16f   :  { %v2758_v49 = vld [vmem:[#allocation6 + $0x260] sm:$0xf]  ;;  %v3013_v50 = vld [vmem:[#allocation6 + $0x268] sm:$0xf0] }
 0x170   :  { %1850 = vmatpush.bf16.msra.mxu0 %v2467_v57  ;;  %1864 = vmatpush.bf16.msra.mxu1 %v2563_v63  ;;  %v2507_v57 = vor.u32 %v2950_v55, %v2506_v40  ;;  %v2603_v63 = vor.u32 %v2974_v60, %v2602_v53  ;;  %v2663_v40 = vor.u32 %v2989_v47, %v2662_v46  ;;  %v2746_v53 = vld [vmem:[#allocation6 + $0x248] sm:$0xf]  ;;  %v3010_v60 = vld [vmem:[#allocation6 + $0x250] sm:$0xf0] }
 0x171   :  { %v2759_v55 = vor.u32 %v3013_v50, %v2758_v49  ;;  %v2747_v62 = vor.u32 %v3010_v60, %v2746_v53 }
 0x172   :  { %1877 = vmatpush.bf16.msra.mxu2 %v2671_v2  ;;  %1891 = vmatpush.bf16.msra.mxu3 %v2767_v3  ;;  %v2807_v2 = vor.u32 %v3025_v44, %v2806_v41  ;;  %v2590_v3 = vld [vmem:[#allocation6 + $0x110] sm:$0xf] }
 0x173   :  { %v2591_v13 = vor.u32 %v2971_v6, %v2590_v3 }
 0x174   :  { %1851 = vmatpush.bf16.msra.mxu0 %v2455_v17  ;;  %1865 = vmatpush.bf16.msra.mxu1 %v2551_v18  ;;  %v2699_v17 = vor.u32 %v2998_v8, %v2698_v7  ;;  %v2795_v18 = vor.u32 %v3022_v10, %v2794_v9 }
 0x176   :  { %1878 = vmatpush.bf16.msra.mxu2 %v2659_v22  ;;  %1892 = vmatpush.bf16.msra.mxu3 %v2755_v23  ;;  %v3019_v22 = vld [vmem:[#allocation6 + $0x298] sm:$0xf0]  ;;  %v2483_v23 = vor.u32 %v2944_v15, %v2482_v14 }
 0x177   :  { %1852 = vmatmul.bf16.vlgmr.msra.gmra.mxu0 %v3274_v54  ;;  %1866 = vmatmul.bf16.vlgmr.msra.gmra.mxu1 %v3278_v59  ;;  %v2783_v28 = vor.u32 %v3019_v22, %v2782_v21 }
 0x178   :  { %1900 = vmatpush.bf16.msrb.mxu0 %v2543_v4  ;;  %1914 = vmatpush.bf16.msrb.mxu1 %v2639_v5  ;;  %v2578_v4 = vld [vmem:[#allocation6 + $0xf8] sm:$0xf]  ;;  %v2968_v5 = vld [vmem:[#allocation6 + $0x100] sm:$0xf0] }
 0x179   :  { %v2579_v24 = vor.u32 %v2968_v5, %v2578_v4 }
 0x17a   :  { %1879 = vmatpush.bf16.msra.mxu2 %v2647_v37  ;;  %1893 = vmatpush.bf16.msra.mxu3 %v2743_v38  ;;  %v2471_v37 = vor.u32 %v2941_v26, %v2470_v25  ;;  %v2567_v38 = vor.u32 %v2965_v30, %v2566_v29  ;;  %v1962_v26 = vld [vmem:[%s3325_s8] sm:$0x7] }
 0x17c   :  { %1901 = vmatpush.bf16.msrb.mxu0 %v2531_v35  ;;  %1915 = vmatpush.bf16.msrb.mxu1 %v2627_v36  ;;  %v2770_v35 = vld [vmem:[#allocation6 + $0x278] sm:$0xf]  ;;  %v3016_v36 = vld [vmem:[#allocation6 + $0x280] sm:$0xf0] }
 0x17d   :  { %1880 = vmatmul.bf16.vlgmr.msra.gmra.mxu2 %v3282_v11  ;;  %1894 = vmatmul.bf16.vlgmr.msra.gmra.mxu3 %v3284_v16 }
 0x17e   :  { %1928 = vmatpush.bf16.msrb.mxu2 %v2735_v42  ;;  %1942 = vmatpush.bf16.msrb.mxu3 %v2831_v34  ;;  %v2675_v42 = vor.u32 %v2992_v32, %v2674_v31  ;;  %v2771_v34 = vor.u32 %v3016_v36, %v2770_v35 }
 0x180   :  { %1902 = vmatpush.bf16.msrb.mxu0 %v2519_v51  ;;  %1916 = vmatpush.bf16.msrb.mxu1 %v2615_v52  ;;  %v2459_v51 = vor.u32 %v2938_v33, %v2458_v39  ;;  %v2555_v52 = vor.u32 %v2962_v45, %v2554_v43  ;;  %v1964_v39 = vperm.slane %v1962_v26, 0 }
 0x182   :  { %1929 = vmatpush.bf16.msrb.mxu2 %v2723_v56  ;;  %1943 = vmatpush.bf16.msrb.mxu3 %v2819_v58  ;;  %v2650_v56 = vld [vmem:[#allocation6 + $0x188] sm:$0xf]  ;;  %v2986_v58 = vld [vmem:[#allocation6 + $0x190] sm:$0xf0] }
 0x183   :  { %v2651_v61 = vor.u32 %v2986_v58, %v2650_v56 }
 0x184   :  { %1903 = vmatpush.bf16.msrb.mxu0 %v2507_v57  ;;  %1917 = vmatpush.bf16.msrb.mxu1 %v2603_v63 }
 0x186   :  { %1930 = vmatpush.bf16.msrb.mxu2 %v2711_v48  ;;  %1944 = vmatpush.bf16.msrb.mxu3 %v2807_v2 }
 0x188   :  { %1904 = vmatpush.bf16.msrb.mxu0 %v2495_v12  ;;  %1918 = vmatpush.bf16.msrb.mxu1 %v2591_v13 }
 0x18a   :  { %1931 = vmatpush.bf16.msrb.mxu2 %v2699_v17  ;;  %1945 = vmatpush.bf16.msrb.mxu3 %v2795_v18 }
 0x18c   :  { %1905 = vmatpush.bf16.msrb.mxu0 %v2483_v23  ;;  %1919 = vmatpush.bf16.msrb.mxu1 %v2579_v24 }
 0x18e   :  { %1932 = vmatpush.bf16.msrb.mxu2 %v2687_v27  ;;  %1946 = vmatpush.bf16.msrb.mxu3 %v2783_v28  ;;  %v1965_v28 = vperm.slane %v1962_v26, 1 }
 0x190   :  { %1906 = vmatpush.bf16.msrb.mxu0 %v2471_v37  ;;  %1920 = vmatpush.bf16.msrb.mxu1 %v2567_v38 }
 0x192   :  { %1933 = vmatpush.bf16.msrb.mxu2 %v2675_v42  ;;  %1947 = vmatpush.bf16.msrb.mxu3 %v2771_v34  ;;  %v1966_v34 = vperm.slane %v1962_v26, 2 }
 0x193   :  { %v975_v41 = vpop.f32.mrf.mxu0  ;;  %v989_v44 = vpop.f32.mrf.mxu1 }
 0x194   :  { %1907 = vmatpush.bf16.msrb.mxu0 %v2459_v51  ;;  %1921 = vmatpush.bf16.msrb.mxu1 %v2555_v52 }
 0x196   :  { %1934 = vmatpush.bf16.msrb.mxu2 %v2663_v40  ;;  %1948 = vmatpush.bf16.msrb.mxu3 %v2759_v55 }
 0x197   :  { %1908 = vmatmul.bf16.vlgmr.msrb.gmra.mxu0 %v3274_v54  ;;  %1922 = vmatmul.bf16.vlgmr.msrb.gmra.mxu1 %v3278_v59  ;;  %v446_v54 = vld [vmem:[%s3322_s5] sm:$0x7] }
 0x198   :  { %v449_v59 = vperm.slane %v446_v54, 1  ;;  %v448_v8 = vperm.slane %v446_v54, 0  ;;  %v450_v18 = vperm.slane %v446_v54, 2 }
 0x19a   :  { %1935 = vmatpush.bf16.msrb.mxu2 %v2651_v61  ;;  %1949 = vmatpush.bf16.msrb.mxu3 %v2747_v62  ;;  %v976_v12 = vadd.f32 %v975_v41, %v448_v8 }
 0x19b   :  { %v977_v57 = vpop.f32.mrf.mxu0  ;;  %v991_v63 = vpop.f32.mrf.mxu1 }
 0x19c   :  { %v990_v15 = vadd.f32 %v989_v44, %v976_v12  ;;  %v978_v21 = vadd.f32 %v977_v57, %v448_v8  ;;  %v1268_v12 = vld [vmem:[%s3324_s7] sm:$0x7] }
 0x19d   :  { %1936 = vmatmul.bf16.vlgmr.msrb.gmra.mxu2 %v3282_v11  ;;  %1950 = vmatmul.bf16.vlgmr.msrb.gmra.mxu3 %v3284_v16 }
 0x19e   :  { %v992_v29 = vadd.f32 %v991_v63, %v978_v21 }
 0x1a0   :  { %v1003_v0 = vpop.f32.mrf.mxu2  ;;  %v1017_v1 = vpop.f32.mrf.mxu3 }
 0x1a1   :  { %v1004_v19 = vadd.f32 %v1003_v0, %v990_v15 }
 0x1a3   :  { %v1018_v25 = vadd.f32 %v1017_v1, %v1004_v19 }
 0x1a4   :  { %v1031_v48 = vpop.f32.mrf.mxu0  ;;  %v1045_v6 = vpop.f32.mrf.mxu1 }
 0x1a5   :  { %v1032_v10 = vadd.f32 %v1031_v48, %v449_v59  ;;  %v1134_v38 = vmax.f32 %v1018_v25, 0.0 }
 0x1a7   :  { %v1046_v13 = vadd.f32 %v1045_v6, %v1032_v10  ;;  %v1970_v49 = vmul.f32 %v1964_v39, %v1134_v38  ;;  %v1984_v38 = vld [vmem:[%s3326_s9] sm:$0x7] }
 0x1a8   :  { %v1005_v2 = vpop.f32.mrf.mxu2  ;;  %v1019_v3 = vpop.f32.mrf.mxu3 }
 0x1a9   :  { %v1006_v33 = vadd.f32 %v1005_v2, %v992_v29 }
 0x1ab   :  { %v1020_v50 = vadd.f32 %v1019_v3, %v1006_v33  ;;  %v1987_v33 = vperm.slane %v1984_v38, 1 }
 0x1ac   :  { %v1033_v7 = vpop.f32.mrf.mxu0  ;;  %v1047_v16 = vpop.f32.mrf.mxu1 }
 0x1ad   :  { %v1034_v20 = vadd.f32 %v1033_v7, %v449_v59  ;;  %v1137_v60 = vmax.f32 %v1020_v50, 0.0 }
 0x1af   :  { %v1048_v27 = vadd.f32 %v1047_v16, %v1034_v20  ;;  %v1973_v63 = vmul.f32 %v1964_v39, %v1137_v60 }
 0x1b0   :  { %v1059_v9 = vpop.f32.mrf.mxu2  ;;  %v1073_v11 = vpop.f32.mrf.mxu3 }
 0x1b1   :  { %v1060_v17 = vadd.f32 %v1059_v9, %v1046_v13  ;;  %v1271_v13 = vperm.slane %v1268_v12, 1 }
 0x1b3   :  { %v1074_v22 = vadd.f32 %v1073_v11, %v1060_v17 }
 0x1b4   :  { %v1087_v14 = vpop.f32.mrf.mxu0  ;;  %v1101_v24 = vpop.f32.mrf.mxu1 }
 0x1b5   :  { %v1088_v23 = vadd.f32 %v1087_v14, %v450_v18  ;;  %v1135_v30 = vmax.f32 %v1074_v22, 0.0 }
 0x1b7   :  { %v1102_v31 = vadd.f32 %v1101_v24, %v1088_v23  ;;  %v1971_v43 = vmul.f32 %v1965_v28, %v1135_v30  ;;  %v1272_v24 = vperm.slane %v1268_v12, 2 }
 0x1b8   :  { %v1061_v4 = vpop.f32.mrf.mxu2  ;;  %v1075_v5 = vpop.f32.mrf.mxu3 }
 0x1b9   :  { %v1062_v32 = vadd.f32 %v1061_v4, %v1048_v27  ;;  %v1976_v58 = vadd.f32 %v1971_v43, %v1970_v49  ;;  %v1986_v49 = vperm.slane %v1984_v38, 0 }
 0x1bb   :  { %v1076_v45 = vadd.f32 %v1075_v5, %v1062_v32 }
 0x1bc   :  { %v1089_v35 = vpop.f32.mrf.mxu0  ;;  %v1103_v52 = vpop.f32.mrf.mxu1 }
 0x1bd   :  { %v1090_v46 = vadd.f32 %v1089_v35, %v450_v18  ;;  %v1138_v40 = vmax.f32 %v1076_v45, 0.0  ;;  %v1270_v18 = vperm.slane %v1268_v12, 0 }
 0x1bf   :  { %v1104_v55 = vadd.f32 %v1103_v52, %v1090_v46  ;;  %v1974_v44 = vmul.f32 %v1965_v28, %v1138_v40  ;;  %v1988_v52 = vperm.slane %v1984_v38, 2 }
 0x1c0   :  { %v1115_v36 = vpop.f32.mrf.mxu2  ;;  %v1129_v37 = vpop.f32.mrf.mxu3 }
 0x1c1   :  { %v1116_v42 = vadd.f32 %v1115_v36, %v1102_v31  ;;  %v1980_v48 = vadd.f32 %v1974_v44, %v1973_v63 }
 0x1c3   :  { %v1130_v47 = vadd.f32 %v1129_v37, %v1116_v42 }
 0x1c5   :  { %v1136_v51 = vmax.f32 %v1130_v47, 0.0 }
 0x1c7   :  { %v1972_v56 = vmul.f32 %v1966_v34, %v1136_v51 }
 0x1c8   :  { %v1117_v53 = vpop.f32.mrf.mxu2  ;;  %v1131_v41 = vpop.f32.mrf.mxu3 }
 0x1c9   :  { %v1118_v61 = vadd.f32 %v1117_v53, %v1104_v55  ;;  %v1977_v62 = vadd.f32 %v1976_v58, %v1972_v56 }
 0x1cb   :  { %v1132_v57 = vadd.f32 %v1131_v41, %v1118_v61  ;;  %1978 = vadd.xlane.f32.xlu0 %v1977_v62 }
 0x1cd   :  { %v1139_v0 = vmax.f32 %v1132_v57, 0.0 }
 0x1cf   :  { %v1975_v1 = vmul.f32 %v1966_v34, %v1139_v0 }
 0x1d1   :  { %v1981_v2 = vadd.f32 %v1980_v48, %v1975_v1 }
 0x1d3   :  { %1982 = vadd.xlane.f32.xlu1 %v1981_v2 }
 0x1d4   :  { %v1797_v3 = vpop.f32.mrf.mxu0  ;;  %v1811_v6 = vpop.f32.mrf.mxu1 }
 0x1d5   :  { %v1798_v5 = vadd.f32 %v1797_v3, %v1270_v18 }
 0x1d7   :  { %v1812_v22 = vadd.f32 %v1811_v6, %v1798_v5 }
 0x1dc   :  { %v1799_v7 = vpop.f32.mrf.mxu0  ;;  %v1813_v8 = vpop.f32.mrf.mxu1 }
 0x1dd   :  { %v1800_v29 = vadd.f32 %v1799_v7, %v1270_v18 }
 0x1df   :  { %v1814_v37 = vadd.f32 %v1813_v8, %v1800_v29 }
 0x1e0   :  { %v1825_v54 = vpop.f32.mrf.mxu2  ;;  %v1839_v59 = vpop.f32.mrf.mxu3 }
 0x1e1   :  { %v1826_v27 = vadd.f32 %v1825_v54, %v1812_v22 }
 0x1e3   :  { %v1840_v35 = vadd.f32 %v1839_v59, %v1826_v27 }
 0x1e5   :  { %v1956_v47 = vmax.f32 %v1840_v35, 0.0 }
 0x1e7   :  { %v1992_v53 = vmul.f32 %v1986_v49, %v1956_v47 }
 0x1e8   :  { %v1827_v11 = vpop.f32.mrf.mxu2  ;;  %v1841_v10 = vpop.f32.mrf.mxu3 }
 0x1e9   :  { %v1828_v50 = vadd.f32 %v1827_v11, %v1814_v37 }
 0x1eb   :  { %v1842_v60 = vadd.f32 %v1841_v10, %v1828_v50 }
 0x1ed   :  { %v1959_v1 = vmax.f32 %v1842_v60, 0.0 }
 0x1ef   :  { %v1995_v54 = vmul.f32 %v1986_v49, %v1959_v1 }
 0x1f4   :  { %v1853_v9 = vpop.f32.mrf.mxu0  ;;  %v1867_v16 = vpop.f32.mrf.mxu1 }
 0x1f5   :  { %v1854_v4 = vadd.f32 %v1853_v9, %v1271_v13 }
 0x1f7   :  { %v1868_v20 = vadd.f32 %v1867_v16, %v1854_v4  ;;  %v3040_v16 = vld [vmem:[%s3327_s10] ss:$0 sm:$0xff] }
 0x1fc   :  { %v1855_v14 = vpop.f32.mrf.mxu0  ;;  %v1869_v19 = vpop.f32.mrf.mxu1 }
 0x1fd   :  { %v1856_v28 = vadd.f32 %v1855_v14, %v1271_v13 }
 0x1ff   :  { %v1870_v36 = vadd.f32 %v1869_v19, %v1856_v28 }
 0x200   :  { %v1881_v15 = vpop.f32.mrf.mxu2  ;;  %v1895_v17 = vpop.f32.mrf.mxu3 }
 0x201   :  { %v1882_v23 = vadd.f32 %v1881_v15, %v1868_v20 }
 0x203   :  { %v1896_v30 = vadd.f32 %v1895_v17, %v1882_v23 }
 0x205   :  { %v1957_v39 = vmax.f32 %v1896_v30, 0.0 }
 0x207   :  { %v1993_v40 = vmul.f32 %v1987_v33, %v1957_v39 }
 0x208   :  { %v1883_v25 = vpop.f32.mrf.mxu2  ;;  %v1897_v26 = vpop.f32.mrf.mxu3 }
 0x209   :  { %v1884_v42 = vadd.f32 %v1883_v25, %v1870_v36  ;;  %v1998_v63 = vadd.f32 %v1993_v40, %v1992_v53 }
 0x20b   :  { %v1898_v55 = vadd.f32 %v1897_v26, %v1884_v42 }
 0x20d   :  { %v1960_v41 = vmax.f32 %v1898_v55, 0.0 }
 0x20f   :  { %v1996_v6 = vmul.f32 %v1987_v33, %v1960_v41 }
 0x211   :  { %v2002_v9 = vadd.f32 %v1996_v6, %v1995_v54 }
 0x214   :  { %v1909_v21 = vpop.f32.mrf.mxu0  ;;  %v1923_v32 = vpop.f32.mrf.mxu1 }
 0x215   :  { %v1910_v31 = vadd.f32 %v1909_v21, %v1272_v24 }
 0x217   :  { %v1924_v34 = vadd.f32 %v1923_v32, %v1910_v31 }
 0x21c   :  { %v1911_v43 = vpop.f32.mrf.mxu0  ;;  %v1925_v62 = vpop.f32.mrf.mxu1 }
 0x21d   :  { %v1912_v56 = vadd.f32 %v1911_v43, %v1272_v24 }
 0x21f   :  { %v1926_v44 = vadd.f32 %v1925_v62, %v1912_v56 }
 0x220   :  { %v1937_v45 = vpop.f32.mrf.mxu2  ;;  %v1951_v46 = vpop.f32.mrf.mxu3 }
 0x221   :  { %v1938_v51 = vadd.f32 %v1937_v45, %v1924_v34 }
 0x223   :  { %v1952_v58 = vadd.f32 %v1951_v46, %v1938_v51 }
 0x225   :  { %v1958_v61 = vmax.f32 %v1952_v58, 0.0 }
 0x227   :  { %v1994_v57 = vmul.f32 %v1988_v52, %v1958_v61 }
 0x228   :  { %v1939_v0 = vpop.f32.mrf.mxu2  ;;  %v1953_v3 = vpop.f32.mrf.mxu3 }
 0x229   :  { %v1940_v48 = vadd.f32 %v1939_v0, %v1926_v44  ;;  %v1999_v2 = vadd.f32 %v1998_v63, %v1994_v57 }
 0x22b   :  { %v1954_v7 = vadd.f32 %v1953_v3, %v1940_v48  ;;  %2000 = vadd.xlane.f32.xlu1 %v1999_v2 }
 0x22d   :  { %v1961_v59 = vmax.f32 %v1954_v7, 0.0 }
 0x22f   :  { %v1997_v8 = vmul.f32 %v1988_v52, %v1961_v59 }
 0x231   :  { %v2003_v11 = vadd.f32 %v2002_v9, %v1997_v8 }
 0x233   :  { %2004 = vadd.xlane.f32.xlu2 %v2003_v11 }
 0x23e   :  { %v1979_v12 = vpop.xlane.xlu0 %1978 }
 0x246   :  { %v1983_v10 = vpop.xlane.xlu1 %1982 }
 0x29e   :  { %v2001_v13 = vpop.xlane.xlu1 %2000 }
 0x29f   :  { %v2007_v14 = vsel %vm2006_vm3, %v1979_v12, %v2001_v13 }
 0x2a0   :  { %v2013_v15 = vadd.f32 %v3040_v16, %v2007_v14 }
 0x2a2   :  { %2016 = vst.msk [vmem:[%s3328_s11] sm:$0xff] %vm2015_vm4, %v2013_v15 }
 0x2a6   :  { %v2005_v17 = vpop.xlane.xlu2 %2004 }
 0x2a7   :  { %v2008_v18 = vsel %vm2006_vm3, %v1983_v10, %v2005_v17 }
 0x2a8   :  { %v2014_v4 = vadd.f32 %v3040_v16, %v2008_v18 }
 0x2aa   :  { %2017 = vst.msk [vmem:[%s3328_s11 + $0x8] sm:$0xff] %vm2015_vm4, %v2014_v4 }
 0x2ab   :  { %2022 = vsyncpa [#allocation3], 1 }
 0x2ac   :  { %2023 = vsyncpa [#allocation5], 1 }

</bundles_post_ra>
